<compile_context>
chip_gen: v6e
topology: v6e:2x2x1
jax: 0.10.0
libtpu: 0.0.40
codegen_flags: <defaults>
</compile_context>

<pallas_src>
import functools

import jax
import jax.numpy as jnp
from jax.experimental import pallas as pl
from jax.experimental.pallas import tpu as pltpu


VMEM_LIMIT = 64 * 1024 * 1024   # explicit scoped-VMEM budget (fits v7x's 64 MiB physical VMEM)


# ----------------------------------------------------------------------------- helpers

def _pick_tile(n, cap=512):
    """Largest tile (power of two, multiple of 8, <= cap) that divides n."""
    for t in (512, 256, 128, 64, 32, 16, 8):
        if t <= cap and n % t == 0:
            return t
    return n


def _layernorm(y, gamma, beta, eps):
    mu = jnp.mean(y, axis=-1, keepdims=True)
    yc = y - mu
    var = jnp.mean(yc * yc, axis=-1, keepdims=True)
    return yc * jax.lax.rsqrt(var + eps) * gamma + beta


def _gelu_tanh(y):
    return 0.5 * y * (1.0 + jnp.tanh(0.7978845608028654 * (y + 0.044715 * y * y * y)))


# ----------------------------------------------------------------------------- kernels

def _attn_block_kernel(xq_ref, xkv_ref, mask_ref, q_w_ref, q_b_ref, kv_w_ref, kv_b_ref,
                       o_w_ref, o_b_ref, ln_g_ref, ln_b_ref, o_ref, k_scr, v_scr,
                       *, num_heads, head_dim, scale, eps):
    """Fused attention block, gridded over (batch, q row tiles).

    K/V for the whole sequence are projected once per batch (qi == 0) into bf16 VMEM
    scratch; each grid step handles one q row tile end-to-end:
      Q proj -> per-head scores + softmax -> context -> out proj -> residual + LayerNorm.
    """
    H = num_heads * head_dim
    S = k_scr.shape[0]
    tq = xq_ref.shape[1]

    @pl.when(pl.program_id(1) == 0)
    def _():
        kv = jnp.dot(xkv_ref[0], kv_w_ref[...],
                     preferred_element_type=jnp.float32) + kv_b_ref[...]      # [S, 2H] f32
        k_scr[...] = kv[:, :H].astype(jnp.bfloat16)
        v_scr[...] = kv[:, H:].astype(jnp.bfloat16)

    xq = xq_ref[0]                                                            # [tq, H] bf16
    q = jnp.dot(xq, q_w_ref[...], preferred_element_type=jnp.float32) + q_b_ref[...]
    q = (q * scale).reshape(tq, num_heads, head_dim).astype(jnp.bfloat16)     # [tq, nH, dh]
    k = k_scr[...].reshape(S, num_heads, head_dim)                            # [S, nH, dh]
    v = v_scr[...].reshape(S, num_heads, head_dim)

    # Heads batched through the MXU in one dot_general (no per-head Python loop / concat).
    s = jnp.einsum("qhd,khd->hqk", q, k, preferred_element_type=jnp.float32)  # [nH, tq, S]
    s = s + mask_ref[...]                                                     # [1,1,S] additive mask
    s_max = jnp.max(s, axis=-1, keepdims=True)
    p = jnp.exp(s - s_max)
    p = p * pl.reciprocal(jnp.sum(p, axis=-1, keepdims=True), approx=True)

    ctx = jnp.einsum("hqk,khd->qhd", p.astype(jnp.bfloat16), v,
                     preferred_element_type=jnp.float32).reshape(tq, H)       # [tq, H] f32

    attn = jnp.dot(ctx.astype(jnp.bfloat16), o_w_ref[...],
                   preferred_element_type=jnp.float32) + o_b_ref[...]
    y = _layernorm(attn + xq.astype(jnp.float32), ln_g_ref[...], ln_b_ref[...], eps)
    o_ref[0] = y.astype(o_ref.dtype)


def _ffn_block_kernel(x_ref, w1_ref, b1_ref, w2_ref, b2_ref, ln_g_ref, ln_b_ref,
                      o_ref, *, eps):
    """Row-tiled fused FFN block: GELU(x@w1+b1)@w2+b2 -> residual + LayerNorm."""
    x = x_ref[...]                                                            # [tm, H] bf16
    h = jnp.dot(x, w1_ref[...], preferred_element_type=jnp.float32) + b1_ref[...]
    h = _gelu_tanh(h)
    f = jnp.dot(h.astype(jnp.bfloat16), w2_ref[...],
                preferred_element_type=jnp.float32) + b2_ref[...]
    y = _layernorm(f + x.astype(jnp.float32), ln_g_ref[...], ln_b_ref[...], eps)
    o_ref[...] = y.astype(o_ref.dtype)


def _layernorm_kernel(x_ref, g_ref, b_ref, o_ref, *, eps):
    y = _layernorm(x_ref[...].astype(jnp.float32), g_ref[...], b_ref[...], eps)
    o_ref[...] = y.astype(o_ref.dtype)


def _head_kernel(x_ref, pw_ref, pb_ref, cw_ref, cb_ref, o_ref):
    """BERT pooler (tanh dense on CLS hidden) + dropout(identity) + classifier."""
    x = x_ref[...]                                                            # [B, H] bf16
    pooled = jnp.tanh(jnp.dot(x, pw_ref[...],
                              preferred_element_type=jnp.float32) + pb_ref[...])
    logits = jnp.dot(pooled.astype(jnp.bfloat16), cw_ref[...],
                     preferred_element_type=jnp.float32) + cb_ref[...]
    o_ref[...] = logits.astype(o_ref.dtype)


# ----------------------------------------------------------------------------- wrappers

def attention_block(x, mask, q_w, q_b, kv_w, kv_b, o_w, o_b, ln_g, ln_b,
                    *, num_heads, eps=1e-12):
    B, S, H = x.shape
    head_dim = H // num_heads
    tq = _pick_tile(S, cap=256)
    kernel = functools.partial(_attn_block_kernel, num_heads=num_heads, head_dim=head_dim,
                               scale=1.0 / (head_dim ** 0.5), eps=eps)
    return pl.pallas_call(
        kernel,
        out_shape=jax.ShapeDtypeStruct((B, S, H), jnp.bfloat16),
        grid=(B, S // tq),
        in_specs=[
            pl.BlockSpec((1, tq, H), lambda b, qi: (b, qi, 0)),    # x (q-tile rows)      bf16
            pl.BlockSpec((1, S, H), lambda b, qi: (b, 0, 0)),      # x (full seq for K/V) bf16
            pl.BlockSpec((1, 1, S), lambda b, qi: (b, 0, 0)),      # additive mask        f32
            pl.BlockSpec((H, H), lambda b, qi: (0, 0)),            # q weight             bf16
            pl.BlockSpec((1, H), lambda b, qi: (0, 0)),            # q bias               f32
            pl.BlockSpec((H, 2 * H), lambda b, qi: (0, 0)),        # fused kv weight      bf16
            pl.BlockSpec((1, 2 * H), lambda b, qi: (0, 0)),        # fused kv bias        f32
            pl.BlockSpec((H, H), lambda b, qi: (0, 0)),            # out-proj weight      bf16
            pl.BlockSpec((1, H), lambda b, qi: (0, 0)),            # out-proj bias        f32
            pl.BlockSpec((1, H), lambda b, qi: (0, 0)),            # LN gamma             f32
            pl.BlockSpec((1, H), lambda b, qi: (0, 0)),            # LN beta              f32
        ],
        out_specs=pl.BlockSpec((1, tq, H), lambda b, qi: (b, qi, 0)),
        scratch_shapes=[pltpu.VMEM((S, H), jnp.bfloat16),          # K scratch (per batch)
                        pltpu.VMEM((S, H), jnp.bfloat16)],         # V scratch (per batch)
        compiler_params=pltpu.CompilerParams(
            dimension_semantics=("parallel", "arbitrary"),
            vmem_limit_bytes=VMEM_LIMIT),
    )(x, x, mask, q_w, q_b.reshape(1, H), kv_w, kv_b.reshape(1, 2 * H),
      o_w, o_b.reshape(1, H), ln_g.reshape(1, H), ln_b.reshape(1, H))


def ffn_block(x, w1, b1, w2, b2, ln_g, ln_b, eps=1e-12):
    M, H = x.shape
    I = w1.shape[1]
    tm = _pick_tile(M, cap=512)
    return pl.pallas_call(
        functools.partial(_ffn_block_kernel, eps=eps),
        out_shape=jax.ShapeDtypeStruct((M, H), jnp.bfloat16),
        grid=(M // tm,),
        in_specs=[
            pl.BlockSpec((tm, H), lambda i: (i, 0)),               # x       bf16
            pl.BlockSpec((H, I), lambda i: (0, 0)),                # w1      bf16
            pl.BlockSpec((1, I), lambda i: (0, 0)),                # b1      f32
            pl.BlockSpec((I, H), lambda i: (0, 0)),                # w2      bf16
            pl.BlockSpec((1, H), lambda i: (0, 0)),                # b2      f32
            pl.BlockSpec((1, H), lambda i: (0, 0)),                # LN gamma
            pl.BlockSpec((1, H), lambda i: (0, 0)),                # LN beta
        ],
        out_specs=pl.BlockSpec((tm, H), lambda i: (i, 0)),
        compiler_params=pltpu.CompilerParams(
            dimension_semantics=("parallel",),
            vmem_limit_bytes=VMEM_LIMIT),
    )(x, w1, b1.reshape(1, I), w2, b2.reshape(1, H), ln_g.reshape(1, H), ln_b.reshape(1, H))


def layernorm(x, gamma, beta, eps=1e-12):
    # TODO(synk): could be fused into the first attention block's input path to save one call.
    M, H = x.shape
    tm = _pick_tile(M, cap=512)
    return pl.pallas_call(
        functools.partial(_layernorm_kernel, eps=eps),
        out_shape=jax.ShapeDtypeStruct((M, H), jnp.bfloat16),
        grid=(M // tm,),
        in_specs=[pl.BlockSpec((tm, H), lambda i: (i, 0)),
                  pl.BlockSpec((1, H), lambda i: (0, 0)),
                  pl.BlockSpec((1, H), lambda i: (0, 0))],
        out_specs=pl.BlockSpec((tm, H), lambda i: (i, 0)),
        compiler_params=pltpu.CompilerParams(dimension_semantics=("parallel",)),
    )(x, gamma.reshape(1, H), beta.reshape(1, H))


def pooler_classifier(x, pool_w, pool_b, cls_w, cls_b):
    B, H = x.shape
    L = cls_w.shape[1]
    return pl.pallas_call(
        _head_kernel,
        out_shape=jax.ShapeDtypeStruct((B, L), jnp.float32),
        grid=(1,),
        in_specs=[pl.BlockSpec((B, H), lambda i: (0, 0)),
                  pl.BlockSpec((H, H), lambda i: (0, 0)),
                  pl.BlockSpec((1, H), lambda i: (0, 0)),
                  pl.BlockSpec((H, L), lambda i: (0, 0)),
                  pl.BlockSpec((1, L), lambda i: (0, 0))],
        out_specs=pl.BlockSpec((B, L), lambda i: (0, 0)),
    )(x, pool_w, pool_b.reshape(1, H), cls_w, cls_b.reshape(1, L))


# ----------------------------------------------------------------------------- model

CFG = dict(
    vocab_size=100,
    type_vocab_size=2,
    max_position=16,
    hidden=32,          # cfg.MODEL.BERT_OUT_SIZE
    heads=2,
    intermediate=64,
    layers=2,
    num_labels=1,       # cfg.CLS.NUM_LABEL
)


def init_params(key, cfg):
    """Deterministic random init.  Matmul weights stored in bf16 (pre-cast once, in HBM)."""
    scale = 0.02
    ks = iter(jax.random.split(key, 16 + 8 * cfg["layers"]))
    nf = lambda shape: scale * jax.random.normal(next(ks), shape, dtype=jnp.float32)
    nb = lambda shape: nf(shape).astype(jnp.bfloat16)          # bf16 matmul weight
    H, I = cfg["hidden"], cfg["intermediate"]
    p = {
        "word_emb": nf((cfg["vocab_size"], H)),
        "pos_emb": nf((cfg["max_position"], H)),
        "type_emb": nf((cfg["type_vocab_size"], H)),
        "emb_ln_g": jnp.ones((H,), jnp.float32),
        "emb_ln_b": jnp.zeros((H,), jnp.float32),
        "pool_w": nb((H, H)),
        "pool_b": jnp.zeros((H,), jnp.float32),
        "cls_w": nb((H, cfg["num_labels"])),
        "cls_b": jnp.zeros((cfg["num_labels"],), jnp.float32),
        "layers": [],
    }
    for _ in range(cfg["layers"]):
        p["layers"].append({
            "q_w": nb((H, H)), "q_b": jnp.zeros((H,), jnp.float32),
            # k | v concatenated along the output dim
            "kv_w": nb((H, 2 * H)), "kv_b": jnp.zeros((2 * H,), jnp.float32),
            "o_w": nb((H, H)), "o_b": jnp.zeros((H,), jnp.float32),
            "attn_ln_g": jnp.ones((H,), jnp.float32),
            "attn_ln_b": jnp.zeros((H,), jnp.float32),
            "ffn_w1": nb((H, I)), "ffn_b1": jnp.zeros((I,), jnp.float32),
            "ffn_w2": nb((I, H)), "ffn_b2": jnp.zeros((H,), jnp.float32),
            "ffn_ln_g": jnp.ones((H,), jnp.float32),
            "ffn_ln_b": jnp.zeros((H,), jnp.float32),
        })
    return p


def bert_base_forward(params, input_ids, masks, token_type_ids, cfg=CFG):
    B, S = input_ids.shape
    H, nH = cfg["hidden"], cfg["heads"]
    M = B * S

    # ---- embeddings (gathers are XLA glue); LayerNorm runs in a Pallas kernel, outputs bf16.
    emb = (jnp.take(params["word_emb"], input_ids, axis=0)
           + params["pos_emb"][None, :S, :]
           + jnp.take(params["type_emb"], token_type_ids, axis=0))            # [B, S, H] f32
    x2d = layernorm(emb.reshape(M, H), params["emb_ln_g"], params["emb_ln_b"])  # bf16

    # ---- additive attention mask, kept as [B, 1, S]; selected per-batch via index_map
    mask3d = ((1.0 - masks.astype(jnp.float32)) * -1e9)[:, None, :]           # [B, 1, S]

    x3d = x2d.reshape(B, S, H)
    for lp in params["layers"]:
        x3d = attention_block(x3d, mask3d,
                              lp["q_w"], lp["q_b"], lp["kv_w"], lp["kv_b"],
                              lp["o_w"], lp["o_b"],
                              lp["attn_ln_g"], lp["attn_ln_b"], num_heads=nH)
        x2d = ffn_block(x3d.reshape(M, H),
                        lp["ffn_w1"], lp["ffn_b1"], lp["ffn_w2"], lp["ffn_b2"],
                        lp["ffn_ln_g"], lp["ffn_ln_b"])
        x3d = x2d.reshape(B, S, H)

    # ---- pooler (tanh on CLS token) + dropout (identity, eval mode) + classifier
    logits = pooler_classifier(x3d[:, 0, :], params["pool_w"], params["pool_b"],
                               params["cls_w"], params["cls_b"])              # [B, num_labels]
    return jnp.squeeze(logits, axis=-1)                                       # [B]


# ----------------------------------------------------------------------------- main

if __name__ == "__main__":
    key = jax.random.PRNGKey(0)
    k_param, k_ids = jax.random.split(key)

    B, S = 2, 8
    params = init_params(k_param, CFG)

    input_ids = jax.random.randint(k_ids, (B, S), 0, CFG["vocab_size"], dtype=jnp.int32)
    token_type_ids = jnp.zeros((B, S), dtype=jnp.int32)
    masks = jnp.array([[1, 1, 1, 1, 1, 1, 1, 1],
                       [1, 1, 1, 1, 1, 0, 0, 0]], dtype=jnp.int32)   # second example is padded

    forward = jax.jit(bert_base_forward)
    logits = forward(params, input_ids, masks, token_type_ids)
    jax.block_until_ready(logits)
    assert logits.shape == (B,), logits.shape
    print("KERNEL_OK")
</pallas_src>

<mosaic_0001>
module attributes {stable_mosaic.version = 11 : i64} {
  func.func @_layernorm_kernel(%arg0: i32, %arg1: memref<16x32xf32, #tpu.memory_space<vmem>>, %arg2: memref<1x32xf32, #tpu.memory_space<vmem>>, %arg3: memref<1x32xf32, #tpu.memory_space<vmem>>, %arg4: memref<16x32xbf16, #tpu.memory_space<vmem>>) attributes {dimension_semantics = [#tpu.dimension_semantics<parallel>], iteration_bounds = array<i64: 1>, scalar_prefetch = 0 : i64, scratch_operands = 0 : i64, tpu.core_type = #tpu.core_type<tc>, window_params = [{transform_indices = @transform_0, window_bounds = array<i64: 16, 32>}, {pipeline_mode = #tpu.pipeline_mode<synchronous>, transform_indices = @transform_1, window_bounds = array<i64: 1, 32>}, {pipeline_mode = #tpu.pipeline_mode<synchronous>, transform_indices = @transform_2, window_bounds = array<i64: 1, 32>}, {transform_indices = @transform_3, window_bounds = array<i64: 16, 32>}]} {
    %c0 = arith.constant 0 : index
    %c0_0 = arith.constant 0 : index
    %0 = vector.load %arg1[%c0, %c0_0] : memref<16x32xf32, #tpu.memory_space<vmem>>, vector<16x32xf32>
    %c0_1 = arith.constant 0 : index
    %c0_2 = arith.constant 0 : index
    %1 = vector.load %arg2[%c0_1, %c0_2] : memref<1x32xf32, #tpu.memory_space<vmem>>, vector<1x32xf32>
    %c0_3 = arith.constant 0 : index
    %c0_4 = arith.constant 0 : index
    %2 = vector.load %arg3[%c0_3, %c0_4] : memref<1x32xf32, #tpu.memory_space<vmem>>, vector<1x32xf32>
    %cst = arith.constant dense<0.000000e+00> : vector<16xf32>
    %3 = vector.multi_reduction <add>, %0, %cst [1] : vector<16x32xf32> to vector<16xf32>
    %4 = vector.shape_cast %3 : vector<16xf32> to vector<16x1xf32>
    %cst_5 = arith.constant 3.200000e+01 : f32
    %5 = vector.broadcast %cst_5 : f32 to vector<16x1xf32>
    %6 = arith.divf %4, %5 : vector<16x1xf32>
    %7 = vector.broadcast %6 : vector<16x1xf32> to vector<16x32xf32>
    %8 = arith.subf %0, %7 : vector<16x32xf32>
    %9 = arith.mulf %8, %8 : vector<16x32xf32>
    %cst_6 = arith.constant dense<0.000000e+00> : vector<16xf32>
    %10 = vector.multi_reduction <add>, %9, %cst_6 [1] : vector<16x32xf32> to vector<16xf32>
    %11 = vector.shape_cast %10 : vector<16xf32> to vector<16x1xf32>
    %cst_7 = arith.constant 3.200000e+01 : f32
    %12 = vector.broadcast %cst_7 : f32 to vector<16x1xf32>
    %13 = arith.divf %11, %12 : vector<16x1xf32>
    %cst_8 = arith.constant 9.99999996E-13 : f32
    %14 = vector.broadcast %cst_8 : f32 to vector<16x1xf32>
    %15 = arith.addf %13, %14 : vector<16x1xf32>
    %16 = math.rsqrt %15 : vector<16x1xf32>
    %17 = vector.broadcast %16 : vector<16x1xf32> to vector<16x32xf32>
    %18 = arith.mulf %8, %17 : vector<16x32xf32>
    %19 = vector.broadcast %1 : vector<1x32xf32> to vector<16x32xf32>
    %20 = arith.mulf %18, %19 : vector<16x32xf32>
    %21 = vector.broadcast %2 : vector<1x32xf32> to vector<16x32xf32>
    %22 = arith.addf %20, %21 : vector<16x32xf32>
    %23 = arith.truncf %22 : vector<16x32xf32> to vector<16x32xbf16>
    %c0_9 = arith.constant 0 : index
    %c0_10 = arith.constant 0 : index
    %24 = vector.load %arg4[%c0_9, %c0_10] : memref<16x32xbf16, #tpu.memory_space<vmem>>, vector<16x32xbf16>
    tpu.vector_store %arg4[%c0_9, %c0_10], %23 {strides = array<i32>} : memref<16x32xbf16, #tpu.memory_space<vmem>>, vector<16x32xbf16>,
    return
  }
  func.func @transform_0(%arg0: i32) -> (i32, i32) {
    %c0_i32 = arith.constant 0 : i32
    %c0_i32_0 = arith.constant 0 : i32
    return %arg0, %c0_i32 : i32, i32
  }
  func.func @transform_1(%arg0: i32) -> (i32, i32) {
    %c0_i32 = arith.constant 0 : i32
    %c0_i32_0 = arith.constant 0 : i32
    %c0_i32_1 = arith.constant 0 : i32
    return %c0_i32, %c0_i32_0 : i32, i32
  }
  func.func @transform_2(%arg0: i32) -> (i32, i32) {
    %c0_i32 = arith.constant 0 : i32
    %c0_i32_0 = arith.constant 0 : i32
    %c0_i32_1 = arith.constant 0 : i32
    return %c0_i32, %c0_i32_0 : i32, i32
  }
  func.func @transform_3(%arg0: i32) -> (i32, i32) {
    %c0_i32 = arith.constant 0 : i32
    %c0_i32_0 = arith.constant 0 : i32
    return %arg0, %c0_i32 : i32, i32
  }
}

module attributes {stable_mosaic.version = 11 : i64} {
  func.func @_ffn_block_kernel(%arg0: i32, %arg1: memref<16x32xbf16, #tpu.memory_space<vmem>>, %arg2: memref<32x64xbf16, #tpu.memory_space<vmem>>, %arg3: memref<1x64xf32, #tpu.memory_space<vmem>>, %arg4: memref<64x32xbf16, #tpu.memory_space<vmem>>, %arg5: memref<1x32xf32, #tpu.memory_space<vmem>>, %arg6: memref<1x32xf32, #tpu.memory_space<vmem>>, %arg7: memref<1x32xf32, #tpu.memory_space<vmem>>, %arg8: memref<16x32xbf16, #tpu.memory_space<vmem>>) attributes {dimension_semantics = [#tpu.dimension_semantics<parallel>], iteration_bounds = array<i64: 1>, scalar_prefetch = 0 : i64, scratch_operands = 0 : i64, tpu.core_type = #tpu.core_type<tc>, window_params = [{transform_indices = @transform_0, window_bounds = array<i64: 16, 32>}, {pipeline_mode = #tpu.pipeline_mode<synchronous>, transform_indices = @transform_1, window_bounds = array<i64: 32, 64>}, {pipeline_mode = #tpu.pipeline_mode<synchronous>, transform_indices = @transform_2, window_bounds = array<i64: 1, 64>}, {pipeline_mode = #tpu.pipeline_mode<synchronous>, transform_indices = @transform_3, window_bounds = array<i64: 64, 32>}, {pipeline_mode = #tpu.pipeline_mode<synchronous>, transform_indices = @transform_4, window_bounds = array<i64: 1, 32>}, {pipeline_mode = #tpu.pipeline_mode<synchronous>, transform_indices = @transform_5, window_bounds = array<i64: 1, 32>}, {pipeline_mode = #tpu.pipeline_mode<synchronous>, transform_indices = @transform_6, window_bounds = array<i64: 1, 32>}, {transform_indices = @transform_7, window_bounds = array<i64: 16, 32>}]} {
    %c0 = arith.constant 0 : index
    %c0_0 = arith.constant 0 : index
    %0 = vector.load %arg1[%c0, %c0_0] : memref<16x32xbf16, #tpu.memory_space<vmem>>, vector<16x32xbf16>
    %c0_1 = arith.constant 0 : index
    %c0_2 = arith.constant 0 : index
    %1 = vector.load %arg2[%c0_1, %c0_2] : memref<32x64xbf16, #tpu.memory_space<vmem>>, vector<32x64xbf16>
    %cst = arith.constant dense<0.000000e+00> : vector<16x64xf32>
    %2 = tpu.matmul %0, %1, %cst {dimension_numbers = #tpu.dot_dimension_numbers<[1], [0], [0], [1], [0, 0, 1, 1], [], []>} : vector<16x32xbf16>, vector<32x64xbf16>, vector<16x64xf32> -> vector<16x64xf32>
    %c0_3 = arith.constant 0 : index
    %c0_4 = arith.constant 0 : index
    %3 = vector.load %arg3[%c0_3, %c0_4] : memref<1x64xf32, #tpu.memory_space<vmem>>, vector<1x64xf32>
    %4 = vector.broadcast %3 : vector<1x64xf32> to vector<16x64xf32>
    %5 = arith.addf %2, %4 : vector<16x64xf32>
    %cst_5 = arith.constant 5.000000e-01 : f32
    %6 = vector.broadcast %cst_5 : f32 to vector<16x64xf32>
    %7 = arith.mulf %6, %5 : vector<16x64xf32>
    %cst_6 = arith.constant 4.471500e-02 : f32
    %8 = vector.broadcast %cst_6 : f32 to vector<16x64xf32>
    %9 = arith.mulf %8, %5 : vector<16x64xf32>
    %10 = arith.mulf %9, %5 : vector<16x64xf32>
    %11 = arith.mulf %10, %5 : vector<16x64xf32>
    %12 = arith.addf %5, %11 : vector<16x64xf32>
    %cst_7 = arith.constant 0.797884583 : f32
    %13 = vector.broadcast %cst_7 : f32 to vector<16x64xf32>
    %14 = arith.mulf %13, %12 : vector<16x64xf32>
    %15 = math.tanh %14 : vector<16x64xf32>
    %cst_8 = arith.constant 1.000000e+00 : f32
    %16 = vector.broadcast %cst_8 : f32 to vector<16x64xf32>
    %17 = arith.addf %16, %15 : vector<16x64xf32>
    %18 = arith.mulf %7, %17 : vector<16x64xf32>
    %19 = arith.truncf %18 : vector<16x64xf32> to vector<16x64xbf16>
    %c0_9 = arith.constant 0 : index
    %c0_10 = arith.constant 0 : index
    %20 = vector.load %arg4[%c0_9, %c0_10] : memref<64x32xbf16, #tpu.memory_space<vmem>>, vector<64x32xbf16>
    %cst_11 = arith.constant dense<0.000000e+00> : vector<16x32xf32>
    %21 = tpu.matmul %19, %20, %cst_11 {dimension_numbers = #tpu.dot_dimension_numbers<[1], [0], [0], [1], [0, 0, 1, 1], [], []>} : vector<16x64xbf16>, vector<64x32xbf16>, vector<16x32xf32> -> vector<16x32xf32>
    %c0_12 = arith.constant 0 : index
    %c0_13 = arith.constant 0 : index
    %22 = vector.load %arg5[%c0_12, %c0_13] : memref<1x32xf32, #tpu.memory_space<vmem>>, vector<1x32xf32>
    %23 = vector.broadcast %22 : vector<1x32xf32> to vector<16x32xf32>
    %24 = arith.addf %21, %23 : vector<16x32xf32>
    %25 = arith.extf %0 : vector<16x32xbf16> to vector<16x32xf32>
    %26 = arith.addf %24, %25 : vector<16x32xf32>
    %c0_14 = arith.constant 0 : index
    %c0_15 = arith.constant 0 : index
    %27 = vector.load %arg6[%c0_14, %c0_15] : memref<1x32xf32, #tpu.memory_space<vmem>>, vector<1x32xf32>
    %c0_16 = arith.constant 0 : index
    %c0_17 = arith.constant 0 : index
    %28 = vector.load %arg7[%c0_16, %c0_17] : memref<1x32xf32, #tpu.memory_space<vmem>>, vector<1x32xf32>
    %cst_18 = arith.constant dense<0.000000e+00> : vector<16xf32>
    %29 = vector.multi_reduction <add>, %26, %cst_18 [1] : vector<16x32xf32> to vector<16xf32>
    %30 = vector.shape_cast %29 : vector<16xf32> to vector<16x1xf32>
    %cst_19 = arith.constant 3.200000e+01 : f32
    %31 = vector.broadcast %cst_19 : f32 to vector<16x1xf32>
    %32 = arith.divf %30, %31 : vector<16x1xf32>
    %33 = vector.broadcast %32 : vector<16x1xf32> to vector<16x32xf32>
    %34 = arith.subf %26, %33 : vector<16x32xf32>
    %35 = arith.mulf %34, %34 : vector<16x32xf32>
    %cst_20 = arith.constant dense<0.000000e+00> : vector<16xf32>
    %36 = vector.multi_reduction <add>, %35, %cst_20 [1] : vector<16x32xf32> to vector<16xf32>
    %37 = vector.shape_cast %36 : vector<16xf32> to vector<16x1xf32>
    %cst_21 = arith.constant 3.200000e+01 : f32
    %38 = vector.broadcast %cst_21 : f32 to vector<16x1xf32>
    %39 = arith.divf %37, %38 : vector<16x1xf32>
    %cst_22 = arith.constant 9.99999996E-13 : f32
    %40 = vector.broadcast %cst_22 : f32 to vector<16x1xf32>
    %41 = arith.addf %39, %40 : vector<16x1xf32>
    %42 = math.rsqrt %41 : vector<16x1xf32>
    %43 = vector.broadcast %42 : vector<16x1xf32> to vector<16x32xf32>
    %44 = arith.mulf %34, %43 : vector<16x32xf32>
    %45 = vector.broadcast %27 : vector<1x32xf32> to vector<16x32xf32>
    %46 = arith.mulf %44, %45 : vector<16x32xf32>
    %47 = vector.broadcast %28 : vector<1x32xf32> to vector<16x32xf32>
    %48 = arith.addf %46, %47 : vector<16x32xf32>
    %49 = arith.truncf %48 : vector<16x32xf32> to vector<16x32xbf16>
    %c0_23 = arith.constant 0 : index
    %c0_24 = arith.constant 0 : index
    %50 = vector.load %arg8[%c0_23, %c0_24] : memref<16x32xbf16, #tpu.memory_space<vmem>>, vector<16x32xbf16>
    tpu.vector_store %arg8[%c0_23, %c0_24], %49 {strides = array<i32>} : memref<16x32xbf16, #tpu.memory_space<vmem>>, vector<16x32xbf16>,
    return
  }
  func.func @transform_0(%arg0: i32) -> (i32, i32) {
    %c0_i32 = arith.constant 0 : i32
    %c0_i32_0 = arith.constant 0 : i32
    return %arg0, %c0_i32 : i32, i32
  }
  func.func @transform_1(%arg0: i32) -> (i32, i32) {
    %c0_i32 = arith.constant 0 : i32
    %c0_i32_0 = arith.constant 0 : i32
    %c0_i32_1 = arith.constant 0 : i32
    return %c0_i32, %c0_i32_0 : i32, i32
  }
  func.func @transform_2(%arg0: i32) -> (i32, i32) {
    %c0_i32 = arith.constant 0 : i32
    %c0_i32_0 = arith.constant 0 : i32
    %c0_i32_1 = arith.constant 0 : i32
    return %c0_i32, %c0_i32_0 : i32, i32
  }
  func.func @transform_3(%arg0: i32) -> (i32, i32) {
    %c0_i32 = arith.constant 0 : i32
    %c0_i32_0 = arith.constant 0 : i32
    %c0_i32_1 = arith.constant 0 : i32
    return %c0_i32, %c0_i32_0 : i32, i32
  }
  func.func @transform_4(%arg0: i32) -> (i32, i32) {
    %c0_i32 = arith.constant 0 : i32
    %c0_i32_0 = arith.constant 0 : i32
    %c0_i32_1 = arith.constant 0 : i32
    return %c0_i32, %c0_i32_0 : i32, i32
  }
  func.func @transform_5(%arg0: i32) -> (i32, i32) {
    %c0_i32 = arith.constant 0 : i32
    %c0_i32_0 = arith.constant 0 : i32
    %c0_i32_1 = arith.constant 0 : i32
    return %c0_i32, %c0_i32_0 : i32, i32
  }
  func.func @transform_6(%arg0: i32) -> (i32, i32) {
    %c0_i32 = arith.constant 0 : i32
    %c0_i32_0 = arith.constant 0 : i32
    %c0_i32_1 = arith.constant 0 : i32
    return %c0_i32, %c0_i32_0 : i32, i32
  }
  func.func @transform_7(%arg0: i32) -> (i32, i32) {
    %c0_i32 = arith.constant 0 : i32
    %c0_i32_0 = arith.constant 0 : i32
    return %arg0, %c0_i32 : i32, i32
  }
}

module attributes {stable_mosaic.version = 11 : i64} {
  func.func @_attn_block_kernel(%arg0: i32, %arg1: i32, %arg2: memref<1x8x32xbf16, #tpu.memory_space<vmem>>, %arg3: memref<1x8x32xbf16, #tpu.memory_space<vmem>>, %arg4: memref<1x1x8xf32, #tpu.memory_space<vmem>>, %arg5: memref<32x32xbf16, #tpu.memory_space<vmem>>, %arg6: memref<1x32xf32, #tpu.memory_space<vmem>>, %arg7: memref<32x64xbf16, #tpu.memory_space<vmem>>, %arg8: memref<1x64xf32, #tpu.memory_space<vmem>>, %arg9: memref<32x32xbf16, #tpu.memory_space<vmem>>, %arg10: memref<1x32xf32, #tpu.memory_space<vmem>>, %arg11: memref<1x32xf32, #tpu.memory_space<vmem>>, %arg12: memref<1x32xf32, #tpu.memory_space<vmem>>, %arg13: memref<1x8x32xbf16, #tpu.memory_space<vmem>>, %arg14: memref<8x32xbf16, #tpu.memory_space<vmem>>, %arg15: memref<8x32xbf16, #tpu.memory_space<vmem>>) attributes {dimension_semantics = [#tpu.dimension_semantics<parallel>, #tpu.dimension_semantics<arbitrary>], iteration_bounds = array<i64: 2, 1>, scalar_prefetch = 0 : i64, scratch_operands = 2 : i64, tpu.core_type = #tpu.core_type<tc>, window_params = [{transform_indices = @transform_0, window_bounds = array<i64: 1, 8, 32>}, {transform_indices = @transform_1, window_bounds = array<i64: 1, 8, 32>}, {transform_indices = @transform_2, window_bounds = array<i64: 1, 1, 8>}, {pipeline_mode = #tpu.pipeline_mode<synchronous>, transform_indices = @transform_3, window_bounds = array<i64: 32, 32>}, {pipeline_mode = #tpu.pipeline_mode<synchronous>, transform_indices = @transform_4, window_bounds = array<i64: 1, 32>}, {pipeline_mode = #tpu.pipeline_mode<synchronous>, transform_indices = @transform_5, window_bounds = array<i64: 32, 64>}, {pipeline_mode = #tpu.pipeline_mode<synchronous>, transform_indices = @transform_6, window_bounds = array<i64: 1, 64>}, {pipeline_mode = #tpu.pipeline_mode<synchronous>, transform_indices = @transform_7, window_bounds = array<i64: 32, 32>}, {pipeline_mode = #tpu.pipeline_mode<synchronous>, transform_indices = @transform_8, window_bounds = array<i64: 1, 32>}, {pipeline_mode = #tpu.pipeline_mode<synchronous>, transform_indices = @transform_9, window_bounds = array<i64: 1, 32>}, {pipeline_mode = #tpu.pipeline_mode<synchronous>, transform_indices = @transform_10, window_bounds = array<i64: 1, 32>}, {transform_indices = @transform_11, window_bounds = array<i64: 1, 8, 32>}]} {
    %c0_i32 = arith.constant 0 : i32
    %0 = arith.cmpi eq, %arg1, %c0_i32 : i32
    %1 = arith.extui %0 : i1 to i32
    %c0_i32_0 = arith.constant 0 : i32
    %2 = arith.cmpi ne, %1, %c0_i32_0 : i32
    scf.if %2 {
      %c0_36 = arith.constant 0 : index
      %c0_37 = arith.constant 0 : index
      %c0_38 = arith.constant 0 : index
      %70 = vector.load %arg3[%c0_36, %c0_37, %c0_38] : memref<1x8x32xbf16, #tpu.memory_space<vmem>>, vector<1x8x32xbf16>
      %71 = vector.shape_cast %70 : vector<1x8x32xbf16> to vector<8x32xbf16>
      %c0_39 = arith.constant 0 : index
      %c0_40 = arith.constant 0 : index
      %72 = vector.load %arg7[%c0_39, %c0_40] : memref<32x64xbf16, #tpu.memory_space<vmem>>, vector<32x64xbf16>
      %cst_41 = arith.constant dense<0.000000e+00> : vector<8x64xf32>
      %73 = tpu.matmul %71, %72, %cst_41 {dimension_numbers = #tpu.dot_dimension_numbers<[1], [0], [0], [1], [0, 0, 1, 1], [], []>} : vector<8x32xbf16>, vector<32x64xbf16>, vector<8x64xf32> -> vector<8x64xf32>
      %c0_42 = arith.constant 0 : index
      %c0_43 = arith.constant 0 : index
      %74 = vector.load %arg8[%c0_42, %c0_43] : memref<1x64xf32, #tpu.memory_space<vmem>>, vector<1x64xf32>
      %75 = vector.broadcast %74 : vector<1x64xf32> to vector<8x64xf32>
      %76 = arith.addf %73, %75 : vector<8x64xf32>
      %77 = vector.extract_strided_slice %76 {offsets = [0, 0], sizes = [8, 32], strides = [1, 1]} : vector<8x64xf32> to vector<8x32xf32>
      %78 = arith.truncf %77 : vector<8x32xf32> to vector<8x32xbf16>
      %c0_44 = arith.constant 0 : index
      %c0_45 = arith.constant 0 : index
      %79 = vector.load %arg14[%c0_44, %c0_45] : memref<8x32xbf16, #tpu.memory_space<vmem>>, vector<8x32xbf16>
      tpu.vector_store %arg14[%c0_44, %c0_45], %78 {strides = array<i32>} : memref<8x32xbf16, #tpu.memory_space<vmem>>, vector<8x32xbf16>,
      %80 = vector.extract_strided_slice %76 {offsets = [0, 32], sizes = [8, 32], strides = [1, 1]} : vector<8x64xf32> to vector<8x32xf32>
      %81 = arith.truncf %80 : vector<8x32xf32> to vector<8x32xbf16>
      %c0_46 = arith.constant 0 : index
      %c0_47 = arith.constant 0 : index
      %82 = vector.load %arg15[%c0_46, %c0_47] : memref<8x32xbf16, #tpu.memory_space<vmem>>, vector<8x32xbf16>
      tpu.vector_store %arg15[%c0_46, %c0_47], %81 {strides = array<i32>} : memref<8x32xbf16, #tpu.memory_space<vmem>>, vector<8x32xbf16>,
    } else {
    }
    %c0 = arith.constant 0 : index
    %c0_1 = arith.constant 0 : index
    %c0_2 = arith.constant 0 : index
    %3 = vector.load %arg2[%c0, %c0_1, %c0_2] : memref<1x8x32xbf16, #tpu.memory_space<vmem>>, vector<1x8x32xbf16>
    %4 = vector.shape_cast %3 : vector<1x8x32xbf16> to vector<8x32xbf16>
    %c0_3 = arith.constant 0 : index
    %c0_4 = arith.constant 0 : index
    %5 = vector.load %arg5[%c0_3, %c0_4] : memref<32x32xbf16, #tpu.memory_space<vmem>>, vector<32x32xbf16>
    %cst = arith.constant dense<0.000000e+00> : vector<8x32xf32>
    %6 = tpu.matmul %4, %5, %cst {dimension_numbers = #tpu.dot_dimension_numbers<[1], [0], [0], [1], [0, 0, 1, 1], [], []>} : vector<8x32xbf16>, vector<32x32xbf16>, vector<8x32xf32> -> vector<8x32xf32>
    %c0_5 = arith.constant 0 : index
    %c0_6 = arith.constant 0 : index
    %7 = vector.load %arg6[%c0_5, %c0_6] : memref<1x32xf32, #tpu.memory_space<vmem>>, vector<1x32xf32>
    %8 = vector.broadcast %7 : vector<1x32xf32> to vector<8x32xf32>
    %9 = arith.addf %6, %8 : vector<8x32xf32>
    %cst_7 = arith.constant 2.500000e-01 : f32
    %10 = vector.broadcast %cst_7 : f32 to vector<8x32xf32>
    %11 = arith.mulf %9, %10 : vector<8x32xf32>
    %12 = vector.shape_cast %11 : vector<8x32xf32> to vector<8x2x16xf32>
    %13 = arith.truncf %12 : vector<8x2x16xf32> to vector<8x2x16xbf16>
    %c0_8 = arith.constant 0 : index
    %c0_9 = arith.constant 0 : index
    %14 = vector.load %arg14[%c0_8, %c0_9] : memref<8x32xbf16, #tpu.memory_space<vmem>>, vector<8x32xbf16>
    %15 = vector.shape_cast %14 : vector<8x32xbf16> to vector<8x2x16xbf16>
    %c0_10 = arith.constant 0 : index
    %c0_11 = arith.constant 0 : index
    %16 = vector.load %arg15[%c0_10, %c0_11] : memref<8x32xbf16, #tpu.memory_space<vmem>>, vector<8x32xbf16>
    %17 = vector.shape_cast %16 : vector<8x32xbf16> to vector<8x2x16xbf16>
    "tpu.trace_start"() <{level = 10 : i32, message = "qhd,khd->hqk"}> : () -> ()
    %cst_12 = arith.constant dense<0.000000e+00> : vector<2x8x8xf32>
    %18 = tpu.matmul %13, %15, %cst_12 {dimension_numbers = #tpu.dot_dimension_numbers<[2], [2], [0], [0], [0, 1, 0, 0, 1, 0], [1], [1]>} : vector<8x2x16xbf16>, vector<8x2x16xbf16>, vector<2x8x8xf32> -> vector<2x8x8xf32>
    "tpu.trace_stop"() : () -> ()
    %c0_13 = arith.constant 0 : index
    %c0_14 = arith.constant 0 : index
    %c0_15 = arith.constant 0 : index
    %19 = vector.load %arg4[%c0_13, %c0_14, %c0_15] : memref<1x1x8xf32, #tpu.memory_space<vmem>>, vector<1x1x8xf32>
    %20 = vector.broadcast %19 : vector<1x1x8xf32> to vector<2x8x8xf32>
    %21 = arith.addf %18, %20 : vector<2x8x8xf32>
    %cst_16 = arith.constant dense<0xFF800000> : vector<2x8xf32>
    %22 = vector.multi_reduction <maximumf>, %21, %cst_16 [2] : vector<2x8x8xf32> to vector<2x8xf32>
    %23 = vector.shape_cast %22 : vector<2x8xf32> to vector<2x8x1xf32>
    %24 = vector.broadcast %23 : vector<2x8x1xf32> to vector<2x8x8xf32>
    %25 = arith.subf %21, %24 : vector<2x8x8xf32>
    %26 = math.exp %25 : vector<2x8x8xf32>
    %cst_17 = arith.constant dense<0.000000e+00> : vector<2x8xf32>
    %27 = vector.multi_reduction <add>, %26, %cst_17 [2] : vector<2x8x8xf32> to vector<2x8xf32>
    %28 = vector.shape_cast %27 : vector<2x8xf32> to vector<2x8x1xf32>
    %29 = tpu.reciprocal %28 {approx = true} : vector<2x8x1xf32> -> vector<2x8x1xf32>
    %30 = vector.broadcast %29 : vector<2x8x1xf32> to vector<2x8x8xf32>
    %31 = arith.mulf %26, %30 : vector<2x8x8xf32>
    %32 = arith.truncf %31 : vector<2x8x8xf32> to vector<2x8x8xbf16>
    "tpu.trace_start"() <{level = 10 : i32, message = "hqk,khd->qhd"}> : () -> ()
    %cst_18 = arith.constant dense<0.000000e+00> : vector<2x16x8xf32>
    %33 = tpu.matmul %17, %32, %cst_18 {dimension_numbers = #tpu.dot_dimension_numbers<[0], [2], [2], [1], [0, 1, 0, 2, 1, 1], [1], [0]>} : vector<8x2x16xbf16>, vector<2x8x8xbf16>, vector<2x16x8xf32> -> vector<2x16x8xf32>
    %34 = tpu.transpose %33, [2, 0, 1] : vector<2x16x8xf32> -> vector<8x2x16xf32>
    "tpu.trace_stop"() : () -> ()
    %35 = vector.shape_cast %34 : vector<8x2x16xf32> to vector<8x32xf32>
    %36 = arith.truncf %35 : vector<8x32xf32> to vector<8x32xbf16>
    %c0_19 = arith.constant 0 : index
    %c0_20 = arith.constant 0 : index
    %37 = vector.load %arg9[%c0_19, %c0_20] : memref<32x32xbf16, #tpu.memory_space<vmem>>, vector<32x32xbf16>
    %cst_21 = arith.constant dense<0.000000e+00> : vector<8x32xf32>
    %38 = tpu.matmul %36, %37, %cst_21 {dimension_numbers = #tpu.dot_dimension_numbers<[1], [0], [0], [1], [0, 0, 1, 1], [], []>} : vector<8x32xbf16>, vector<32x32xbf16>, vector<8x32xf32> -> vector<8x32xf32>
    %c0_22 = arith.constant 0 : index
    %c0_23 = arith.constant 0 : index
    %39 = vector.load %arg10[%c0_22, %c0_23] : memref<1x32xf32, #tpu.memory_space<vmem>>, vector<1x32xf32>
    %40 = vector.broadcast %39 : vector<1x32xf32> to vector<8x32xf32>
    %41 = arith.addf %38, %40 : vector<8x32xf32>
    %42 = arith.extf %4 : vector<8x32xbf16> to vector<8x32xf32>
    %43 = arith.addf %41, %42 : vector<8x32xf32>
    %c0_24 = arith.constant 0 : index
    %c0_25 = arith.constant 0 : index
    %44 = vector.load %arg11[%c0_24, %c0_25] : memref<1x32xf32, #tpu.memory_space<vmem>>, vector<1x32xf32>
    %c0_26 = arith.constant 0 : index
    %c0_27 = arith.constant 0 : index
    %45 = vector.load %arg12[%c0_26, %c0_27] : memref<1x32xf32, #tpu.memory_space<vmem>>, vector<1x32xf32>
    %cst_28 = arith.constant dense<0.000000e+00> : vector<8xf32>
    %46 = vector.multi_reduction <add>, %43, %cst_28 [1] : vector<8x32xf32> to vector<8xf32>
    %47 = vector.shape_cast %46 : vector<8xf32> to vector<8x1xf32>
    %cst_29 = arith.constant 3.200000e+01 : f32
    %48 = vector.broadcast %cst_29 : f32 to vector<8x1xf32>
    %49 = arith.divf %47, %48 : vector<8x1xf32>
    %50 = vector.broadcast %49 : vector<8x1xf32> to vector<8x32xf32>
    %51 = arith.subf %43, %50 : vector<8x32xf32>
    %52 = arith.mulf %51, %51 : vector<8x32xf32>
    %cst_30 = arith.constant dense<0.000000e+00> : vector<8xf32>
    %53 = vector.multi_reduction <add>, %52, %cst_30 [1] : vector<8x32xf32> to vector<8xf32>
    %54 = vector.shape_cast %53 : vector<8xf32> to vector<8x1xf32>
    %cst_31 = arith.constant 3.200000e+01 : f32
    %55 = vector.broadcast %cst_31 : f32 to vector<8x1xf32>
    %56 = arith.divf %54, %55 : vector<8x1xf32>
    %cst_32 = arith.constant 9.99999996E-13 : f32
    %57 = vector.broadcast %cst_32 : f32 to vector<8x1xf32>
    %58 = arith.addf %56, %57 : vector<8x1xf32>
    %59 = math.rsqrt %58 : vector<8x1xf32>
    %60 = vector.broadcast %59 : vector<8x1xf32> to vector<8x32xf32>
    %61 = arith.mulf %51, %60 : vector<8x32xf32>
    %62 = vector.broadcast %44 : vector<1x32xf32> to vector<8x32xf32>
    %63 = arith.mulf %61, %62 : vector<8x32xf32>
    %64 = vector.broadcast %45 : vector<1x32xf32> to vector<8x32xf32>
    %65 = arith.addf %63, %64 : vector<8x32xf32>
    %66 = arith.truncf %65 : vector<8x32xf32> to vector<8x32xbf16>
    %c0_33 = arith.constant 0 : index
    %c0_34 = arith.constant 0 : index
    %c0_35 = arith.constant 0 : index
    %67 = vector.load %arg13[%c0_33, %c0_34, %c0_35] : memref<1x8x32xbf16, #tpu.memory_space<vmem>>, vector<1x8x32xbf16>
    %68 = vector.shape_cast %67 : vector<1x8x32xbf16> to vector<8x32xbf16>
    %69 = vector.shape_cast %66 : vector<8x32xbf16> to vector<1x8x32xbf16>
    tpu.vector_store %arg13[%c0_33, %c0_34, %c0_35], %69 {strides = array<i32>} : memref<1x8x32xbf16, #tpu.memory_space<vmem>>, vector<1x8x32xbf16>,
    return
  }
  func.func @transform_0(%arg0: i32, %arg1: i32) -> (i32, i32, i32) {
    %c0_i32 = arith.constant 0 : i32
    %c0_i32_0 = arith.constant 0 : i32
    return %arg0, %arg1, %c0_i32 : i32, i32, i32
  }
  func.func @transform_1(%arg0: i32, %arg1: i32) -> (i32, i32, i32) {
    %c0_i32 = arith.constant 0 : i32
    %c0_i32_0 = arith.constant 0 : i32
    %c0_i32_1 = arith.constant 0 : i32
    return %arg0, %c0_i32, %c0_i32_0 : i32, i32, i32
  }
  func.func @transform_2(%arg0: i32, %arg1: i32) -> (i32, i32, i32) {
    %c0_i32 = arith.constant 0 : i32
    %c0_i32_0 = arith.constant 0 : i32
    %c0_i32_1 = arith.constant 0 : i32
    return %arg0, %c0_i32, %c0_i32_0 : i32, i32, i32
  }
  func.func @transform_3(%arg0: i32, %arg1: i32) -> (i32, i32) {
    %c0_i32 = arith.constant 0 : i32
    %c0_i32_0 = arith.constant 0 : i32
    %c0_i32_1 = arith.constant 0 : i32
    return %c0_i32, %c0_i32_0 : i32, i32
  }
  func.func @transform_4(%arg0: i32, %arg1: i32) -> (i32, i32) {
    %c0_i32 = arith.constant 0 : i32
    %c0_i32_0 = arith.constant 0 : i32
    %c0_i32_1 = arith.constant 0 : i32
    return %c0_i32, %c0_i32_0 : i32, i32
  }
  func.func @transform_5(%arg0: i32, %arg1: i32) -> (i32, i32) {
    %c0_i32 = arith.constant 0 : i32
    %c0_i32_0 = arith.constant 0 : i32
    %c0_i32_1 = arith.constant 0 : i32
    return %c0_i32, %c0_i32_0 : i32, i32
  }
  func.func @transform_6(%arg0: i32, %arg1: i32) -> (i32, i32) {
    %c0_i32 = arith.constant 0 : i32
    %c0_i32_0 = arith.constant 0 : i32
    %c0_i32_1 = arith.constant 0 : i32
    return %c0_i32, %c0_i32_0 : i32, i32
  }
  func.func @transform_7(%arg0: i32, %arg1: i32) -> (i32, i32) {
    %c0_i32 = arith.constant 0 : i32
    %c0_i32_0 = arith.constant 0 : i32
    %c0_i32_1 = arith.constant 0 : i32
    return %c0_i32, %c0_i32_0 : i32, i32
  }
  func.func @transform_8(%arg0: i32, %arg1: i32) -> (i32, i32) {
    %c0_i32 = arith.constant 0 : i32
    %c0_i32_0 = arith.constant 0 : i32
    %c0_i32_1 = arith.constant 0 : i32
    return %c0_i32, %c0_i32_0 : i32, i32
  }
  func.func @transform_9(%arg0: i32, %arg1: i32) -> (i32, i32) {
    %c0_i32 = arith.constant 0 : i32
    %c0_i32_0 = arith.constant 0 : i32
    %c0_i32_1 = arith.constant 0 : i32
    return %c0_i32, %c0_i32_0 : i32, i32
  }
  func.func @transform_10(%arg0: i32, %arg1: i32) -> (i32, i32) {
    %c0_i32 = arith.constant 0 : i32
    %c0_i32_0 = arith.constant 0 : i32
    %c0_i32_1 = arith.constant 0 : i32
    return %c0_i32, %c0_i32_0 : i32, i32
  }
  func.func @transform_11(%arg0: i32, %arg1: i32) -> (i32, i32, i32) {
    %c0_i32 = arith.constant 0 : i32
    %c0_i32_0 = arith.constant 0 : i32
    return %arg0, %arg1, %c0_i32 : i32, i32, i32
  }
}

module attributes {stable_mosaic.version = 11 : i64} {
  func.func @_head_kernel(%arg0: i32, %arg1: memref<2x32xbf16, #tpu.memory_space<vmem>>, %arg2: memref<32x32xbf16, #tpu.memory_space<vmem>>, %arg3: memref<1x32xf32, #tpu.memory_space<vmem>>, %arg4: memref<32x1xbf16, #tpu.memory_space<vmem>>, %arg5: memref<1x1xf32, #tpu.memory_space<vmem>>, %arg6: memref<2x1xf32, #tpu.memory_space<vmem>>) attributes {dimension_semantics = [#tpu.dimension_semantics<arbitrary>], iteration_bounds = array<i64: 1>, scalar_prefetch = 0 : i64, scratch_operands = 0 : i64, tpu.core_type = #tpu.core_type<tc>, window_params = [{pipeline_mode = #tpu.pipeline_mode<synchronous>, transform_indices = @transform_0, window_bounds = array<i64: 2, 32>}, {pipeline_mode = #tpu.pipeline_mode<synchronous>, transform_indices = @transform_1, window_bounds = array<i64: 32, 32>}, {pipeline_mode = #tpu.pipeline_mode<synchronous>, transform_indices = @transform_2, window_bounds = array<i64: 1, 32>}, {pipeline_mode = #tpu.pipeline_mode<synchronous>, transform_indices = @transform_3, window_bounds = array<i64: 32, 1>}, {pipeline_mode = #tpu.pipeline_mode<synchronous>, transform_indices = @transform_4, window_bounds = array<i64: 1, 1>}, {pipeline_mode = #tpu.pipeline_mode<synchronous>, transform_indices = @transform_5, window_bounds = array<i64: 2, 1>}]} {
    %c0 = arith.constant 0 : index
    %c0_0 = arith.constant 0 : index
    %0 = vector.load %arg1[%c0, %c0_0] : memref<2x32xbf16, #tpu.memory_space<vmem>>, vector<2x32xbf16>
    %c0_1 = arith.constant 0 : index
    %c0_2 = arith.constant 0 : index
    %1 = vector.load %arg2[%c0_1, %c0_2] : memref<32x32xbf16, #tpu.memory_space<vmem>>, vector<32x32xbf16>
    %cst = arith.constant dense<0.000000e+00> : vector<2x32xf32>
    %2 = tpu.matmul %0, %1, %cst {dimension_numbers = #tpu.dot_dimension_numbers<[1], [0], [0], [1], [0, 0, 1, 1], [], []>} : vector<2x32xbf16>, vector<32x32xbf16>, vector<2x32xf32> -> vector<2x32xf32>
    %c0_3 = arith.constant 0 : index
    %c0_4 = arith.constant 0 : index
    %3 = vector.load %arg3[%c0_3, %c0_4] : memref<1x32xf32, #tpu.memory_space<vmem>>, vector<1x32xf32>
    %4 = vector.broadcast %3 : vector<1x32xf32> to vector<2x32xf32>
    %5 = arith.addf %2, %4 : vector<2x32xf32>
    %6 = math.tanh %5 : vector<2x32xf32>
    %7 = arith.truncf %6 : vector<2x32xf32> to vector<2x32xbf16>
    %c0_5 = arith.constant 0 : index
    %c0_6 = arith.constant 0 : index
    %8 = vector.load %arg4[%c0_5, %c0_6] : memref<32x1xbf16, #tpu.memory_space<vmem>>, vector<32x1xbf16>
    %cst_7 = arith.constant dense<0.000000e+00> : vector<2x1xf32>
    %9 = tpu.matmul %7, %8, %cst_7 {dimension_numbers = #tpu.dot_dimension_numbers<[1], [0], [0], [1], [0, 0, 1, 1], [], []>} : vector<2x32xbf16>, vector<32x1xbf16>, vector<2x1xf32> -> vector<2x1xf32>
    %c0_8 = arith.constant 0 : index
    %c0_9 = arith.constant 0 : index
    %10 = vector.load %arg5[%c0_8, %c0_9] : memref<1x1xf32, #tpu.memory_space<vmem>>, vector<1x1xf32>
    %11 = vector.broadcast %10 : vector<1x1xf32> to vector<2x1xf32>
    %12 = arith.addf %9, %11 : vector<2x1xf32>
    %c0_10 = arith.constant 0 : index
    %c0_11 = arith.constant 0 : index
    %13 = vector.load %arg6[%c0_10, %c0_11] : memref<2x1xf32, #tpu.memory_space<vmem>>, vector<2x1xf32>
    tpu.vector_store %arg6[%c0_10, %c0_11], %12 {strides = array<i32>} : memref<2x1xf32, #tpu.memory_space<vmem>>, vector<2x1xf32>,
    return
  }
  func.func @transform_0(%arg0: i32) -> (i32, i32) {
    %c0_i32 = arith.constant 0 : i32
    %c0_i32_0 = arith.constant 0 : i32
    %c0_i32_1 = arith.constant 0 : i32
    return %c0_i32, %c0_i32_0 : i32, i32
  }
  func.func @transform_1(%arg0: i32) -> (i32, i32) {
    %c0_i32 = arith.constant 0 : i32
    %c0_i32_0 = arith.constant 0 : i32
    %c0_i32_1 = arith.constant 0 : i32
    return %c0_i32, %c0_i32_0 : i32, i32
  }
  func.func @transform_2(%arg0: i32) -> (i32, i32) {
    %c0_i32 = arith.constant 0 : i32
    %c0_i32_0 = arith.constant 0 : i32
    %c0_i32_1 = arith.constant 0 : i32
    return %c0_i32, %c0_i32_0 : i32, i32
  }
  func.func @transform_3(%arg0: i32) -> (i32, i32) {
    %c0_i32 = arith.constant 0 : i32
    %c0_i32_0 = arith.constant 0 : i32
    %c0_i32_1 = arith.constant 0 : i32
    return %c0_i32, %c0_i32_0 : i32, i32
  }
  func.func @transform_4(%arg0: i32) -> (i32, i32) {
    %c0_i32 = arith.constant 0 : i32
    %c0_i32_0 = arith.constant 0 : i32
    %c0_i32_1 = arith.constant 0 : i32
    return %c0_i32, %c0_i32_0 : i32, i32
  }
  func.func @transform_5(%arg0: i32) -> (i32, i32) {
    %c0_i32 = arith.constant 0 : i32
    %c0_i32_0 = arith.constant 0 : i32
    %c0_i32_1 = arith.constant 0 : i32
    return %c0_i32, %c0_i32_0 : i32, i32
  }
}

</mosaic_0001>

<bundles_post_ra>
// kernel: bert_base_forward.6
= control target key start
LH: loop header
LB: loop body
LE: loop exit
PB: predicated region body
PF: predicated region fallthrough
CT: control target
= control target key end

     0   :  { %vm18_vm0 = vcmask 261120   ;;  %vm70_vm1 = vcmask 257024   ;;  %s129_s0 = inlined_call_operand.vmem [shape: f32[16,32], index: 0, kind: input, shape index: {}]   ;;  %s130_s1 = inlined_call_operand.vmem [shape: f32[1,32], index: 1, kind: input, shape index: {}]   ;;  %s131_s2 = inlined_call_operand.vmem [shape: f32[1,32], index: 2, kind: input, shape index: {}]   ;;  %s132_s3 = inlined_call_operand.vmem [shape: bf16[16,32], index: 3, kind: output, shape index: {}]  }
   0x1   :  { %v14_v0 = vld [vmem:[%s129_s0] sm:$0xff]  ;;  %v15_v1 = vld [vmem:[%s129_s0 + $0x8] sm:$0xff] }
   0x2   :  { %v19_v2 = vsel %vm18_vm0, %v14_v0, 0.0  ;;  %v22_v3 = vsel %vm18_vm0, %v15_v1, 0.0  ;;  %v77_v21 = vld [vmem:[%s130_s1] ss:$0 sm:$0xff] }
   0x3   :  { %20 = vadd.xlane.f32.xlu0 %v19_v2  ;;  %v78_v23 = vld [vmem:[%s131_s2] ss:$0 sm:$0xff] }
   0x7   :  { %23 = vadd.xlane.f32.xlu0 %v22_v3 }
  0x8c   :  { %v21_v4 = vpop.xlane.xlu0 %20 }
  0x8d   :  { %v26_v5 = vmul.f32 0.03125, %v21_v4 }
  0x8f   :  { %v28_v6 = vsub.f32 %v14_v0, %v26_v5 }
  0x90   :  { %v24_v7 = vpop.xlane.xlu0 %23 }
  0x91   :  { %v27_v8 = vmul.f32 0.03125, %v24_v7  ;;  %v30_v9 = vmul.f32 %v28_v6, %v28_v6 }
  0x93   :  { %v29_v10 = vsub.f32 %v15_v1, %v27_v8  ;;  %v32_v11 = vsel %vm18_vm0, %v30_v9, 0.0 }
  0x94   :  { %33 = vadd.xlane.f32.xlu1 %v32_v11 }
  0x95   :  { %v31_v12 = vmul.f32 %v29_v10, %v29_v10 }
  0x97   :  { %v35_v13 = vsel %vm18_vm0, %v31_v12, 0.0 }
  0x98   :  { %36 = vadd.xlane.f32.xlu1 %v35_v13 }
 0x11d   :  { %v34_v14 = vpop.xlane.xlu1 %33 }
 0x11e   :  { %v38_v15 = vmul.f32 0.03125, %v34_v14 }
 0x120   :  { %v40_v16 = vadd.f32 1e-12, %v38_v15 }
 0x121   :  { %v37_v17 = vpop.xlane.xlu1 %36 }
 0x122   :  { %83 = vrsqrt.f32 %v40_v16  ;;  %v39_v18 = vmul.f32 0.03125, %v37_v17 }
 0x124   :  { %v41_v19 = vadd.f32 1e-12, %v39_v18 }
 0x126   :  { %85 = vrsqrt.f32 %v41_v19 }
 0x12f   :  { %v84_v20 = vpop.eup %83 }
 0x130   :  { %v44_v22 = vmul.f32 %v84_v20, %v28_v6 }
 0x132   :  { %v52_v24 = vmul.f32 %v77_v21, %v44_v22 }
 0x133   :  { %v86_v25 = vpop.eup %85 }
 0x134   :  { %v60_v26 = vadd.f32 %v78_v23, %v52_v24  ;;  %v45_v27 = vmul.f32 %v86_v25, %v29_v10 }
 0x136   :  { %v81_v28 = vpack.c.bf16 %v60_v26, %v60_v26  ;;  %v53_v29 = vmul.f32 %v77_v21, %v45_v27 }
 0x138   :  { %71 = vst.msk [vmem:[%s132_s3] sm:$0xf] %vm70_vm1, %v81_v28  ;;  %v61_v30 = vadd.f32 %v78_v23, %v53_v29 }
 0x13a   :  { %v82_v31 = vpack.c.bf16 %v61_v30, %v61_v30 }
 0x13c   :  { %72 = vst.msk [vmem:[%s132_s3 + $0x4] sm:$0xf] %vm70_vm1, %v82_v31 }

// kernel: bert_base_forward.11
= control target key start
LH: loop header
LB: loop body
LE: loop exit
PB: predicated region body
PF: predicated region fallthrough
CT: control target
= control target key end

     0   :  { %v203_v0 = vmov 0.0   ;;  %vm204_vm0 = vmmov 0   ;;  %vm47_vm1 = vcmask 261120   ;;  %vm159_vm2 = vcmask 1024   ;;  %s261_s1 = inlined_call_operand.vmem [shape: bf16[32,32], index: 1, kind: input, shape index: {}]   ;;  %s262_s0 = inlined_call_operand.vmem [shape: bf16[2,32], index: 0, kind: input, shape index: {}]   ;;  %s263_s3 = inlined_call_operand.vmem [shape: bf16[32,1], index: 3, kind: input, shape index: {}]   ;;  %s264_s4 = inlined_call_operand.<no memory space> [shape: f32[1,1], index: 4, kind: input, shape index: {}]   ;;  %s265_s2 = inlined_call_operand.vmem [shape: f32[1,32], index: 2, kind: input, shape index: {}]   ;;  %s266_s5 = inlined_call_operand.vmem [shape: f32[2,1], index: 5, kind: output, shape index: {}]  }
   0x1   :  { %179 = vmatprep.subr.bf16.mxu0 %v203_v0  ;;  %v197_v1 = vld [vmem:[%s261_s1 + $0x8] sm:$0xff]   ;;  %183 = vmatprep.mubr.msk.bf16.mxu0 %vm204_vm0, %v203_v0  ;;  %v198_v2 = vld [vmem:[%s261_s1] sm:$0xff]   ;;  %v10_v6 = vstv %s264_s4 }
   0x2   :  { %187 = vmatprep.subr.bf16.mxu1 %v203_v0  ;;  %191 = vmatprep.mubr.msk.bf16.mxu1 %vm204_vm0, %v203_v0  ;;  %v23_v3 = vld [vmem:[%s262_s0] sm:$0x1]  ;;  %v199_v4 = vld [vmem:[%s263_s3 + $0x8] sm:$0xff]   ;;  %11 = vst [vmem:[#allocation2] sm:$0x1] %v10_v6 }
   0x3   :  { %180 = vmatpush3.bf16.msra.mxu0 %v197_v1  ;;  %188 = vmatpush3.bf16.msra.mxu1 %v199_v4  ;;  %v200_v5 = vld [vmem:[%s263_s3] sm:$0xff]  }
   0x4   :  { %181 = vmatprep.subr.bf16.mxu0 %v203_v0  ;;  %189 = vmatprep.subr.bf16.mxu1 %v203_v0  ;;  %v165_v7 = vld [vmem:[%s265_s2] ss:$0 sm:$0xff] }
   0x7   :  { %182 = vmatpush3.bf16.msra.mxu0 %v198_v2  ;;  %190 = vmatpush3.bf16.msra.mxu1 %v200_v5 }
   0x9   :  { %v169_v15 = vld [vmem:[#allocation2] ss:$0 sm:$0xff] }
   0xa   :  { %184 = vmatmul.mubr.msk.bf16.vlgmr.msra.gmra.mxu0 %vm47_vm1, %v23_v3 }
  0xca   :  { %v85_v8 = vpop.f32.mrf.mxu0 }
  0xcb   :  { %v86_v9 = vadd.f32 %v165_v7, %v85_v8 }
  0xcc   :  { %v185_v10 = vpop.f32.mrf.mxu0 }
  0xcd   :  { %201 = vtanh.f32 %v86_v9 }
  0xce   :  { %v88_v11 = vpop.f32.mrf.mxu0 }
  0xd0   :  { %v186_v12 = vpop.f32.mrf.mxu0 }
  0xda   :  { %v202_v13 = vpop.eup %201 }
  0xdb   :  { %v92_v14 = vpack.c.bf16 %v202_v13, %v202_v13 }
  0xdd   :  { %192 = vmatmul.mubr.msk.bf16.vlgmr.msra.gmra.mxu1 %vm47_vm1, %v92_v14 }
 0x19d   :  { %v153_v16 = vpop.f32.mrf.mxu1 }
 0x19e   :  { %v154_v17 = vadd.f32 %v169_v15, %v153_v16 }
 0x19f   :  { %v193_v18 = vpop.f32.mrf.mxu1 }
 0x1a0   :  { %160 = vst.msk [vmem:[%s266_s5] sm:$0x3] %vm159_vm2, %v154_v17 }
 0x1a1   :  { %v156_v19 = vpop.f32.mrf.mxu1 }
 0x1a3   :  { %v194_v20 = vpop.f32.mrf.mxu1 }

// kernel: bert_base_forward.8
= control target key start
LH: loop header
LB: loop body
LE: loop exit
PB: predicated region body
PF: predicated region fallthrough
CT: control target
= control target key end

     0   :  { %v332_v0 = vmov 0.0   ;;  %vm333_vm0 = vmmov 0   ;;  %vm57_vm1 = vcmask 261120   ;;  %vm160_vm2 = vcmask 523264   ;;  %s418_s1 = inlined_call_operand.vmem [shape: bf16[32,64], index: 1, kind: input, shape index: {}]   ;;  %s419_s0 = inlined_call_operand.vmem [shape: bf16[16,32], index: 0, kind: input, shape index: {}]   ;;  %s420_s3 = inlined_call_operand.vmem [shape: bf16[64,32], index: 3, kind: input, shape index: {}]   ;;  %s421_s2 = inlined_call_operand.vmem [shape: f32[1,64], index: 2, kind: input, shape index: {}]   ;;  %s422_s4 = inlined_call_operand.vmem [shape: f32[1,32], index: 4, kind: input, shape index: {}]   ;;  %s423_s5 = inlined_call_operand.vmem [shape: f32[1,32], index: 5, kind: input, shape index: {}]   ;;  %s424_s6 = inlined_call_operand.vmem [shape: f32[1,32], index: 6, kind: input, shape index: {}]   ;;  %s425_s7 = inlined_call_operand.vmem [shape: bf16[16,32], index: 7, kind: output, shape index: {}]  }
   0x1   :  { %294 = vmatprep.subr.bf16.mxu0 %v332_v0  ;;  %v316_v1 = vld [vmem:[%s418_s1 + $0x8] sm:$0xff]   ;;  %298 = vmatprep.mubr.msk.bf16.mxu0 %vm333_vm0, %v332_v0  ;;  %v317_v2 = vld [vmem:[%s418_s1] sm:$0xff]   ;;  %v319_v4 = vld [vmem:[%s420_s3 + $0x18] sm:$0xff]   ;;  %vm262_vm3 = vcmask 257024  }
   0x2   :  { %302 = vmatprep.subr.bf16.mxu1 %v332_v0  ;;  %310 = vmatprep.mubr.msk.bf16.mxu1 %vm333_vm0, %v332_v0  ;;  %v27_v3 = vld [vmem:[%s419_s0] sm:$0xff]   ;;  %v320_v5 = vld [vmem:[%s420_s3 + $0x10] sm:$0xff]   ;;  %v321_v6 = vld [vmem:[%s420_s3 + $0x8] sm:$0xff]  }
   0x3   :  { %295 = vmatpush3.bf16.msra.mxu0 %v316_v1  ;;  %303 = vmatpush3.bf16.msra.mxu1 %v319_v4  ;;  %v322_v7 = vld [vmem:[%s420_s3] sm:$0xff]   ;;  %v205_v35 = vunpack.c.l.bf16 %v27_v3  ;;  %v206_v40 = vunpack.c.h.bf16 %v27_v3 }
   0x4   :  { %296 = vmatprep.subr.bf16.mxu0 %v332_v0  ;;  %304 = vmatprep.subr.bf16.mxu1 %v332_v0  ;;  %v269_v8 = vld [vmem:[%s421_s2] ss:$0 sm:$0xff] }
   0x5   :  { %v274_v34 = vld [vmem:[%s422_s4] ss:$0 sm:$0xff] }
   0x7   :  { %297 = vmatpush3.bf16.msra.mxu0 %v317_v2  ;;  %305 = vmatpush3.bf16.msra.mxu1 %v320_v5  ;;  %v281_v2 = vld [vmem:[%s424_s6] ss:$0 sm:$0xff] }
   0x8   :  { %306 = vmatprep.subr.bf16.mxu1 %v332_v0 }
   0xa   :  { %299 = vmatmul.mubr.msk.bf16.vlgmr.msra.gmra.mxu0 %vm57_vm1, %v27_v3 }
   0xb   :  { %307 = vmatpush3.bf16.msra.mxu1 %v321_v6 }
   0xc   :  { %308 = vmatprep.subr.bf16.mxu1 %v332_v0  ;;  %v280_v0 = vld [vmem:[%s423_s5] ss:$0 sm:$0xff] }
   0xf   :  { %309 = vmatpush3.bf16.msra.mxu1 %v322_v7 }
  0xca   :  { %v95_v9 = vpop.f32.mrf.mxu0 }
  0xcb   :  { %v96_v10 = vadd.f32 %v269_v8, %v95_v9 }
  0xcc   :  { %v300_v11 = vpop.f32.mrf.mxu0 }
  0xcd   :  { %v104_v12 = vmul.f32 0.044715, %v96_v10  ;;  %v102_v28 = vmul.f32 0.5, %v96_v10 }
  0xce   :  { %v98_v13 = vpop.f32.mrf.mxu0 }
  0xcf   :  { %v106_v14 = vmul.f32 %v104_v12, %v96_v10  ;;  %v99_v15 = vadd.f32 %v269_v8, %v98_v13 }
  0xd0   :  { %v301_v16 = vpop.f32.mrf.mxu0 }
  0xd1   :  { %v108_v17 = vmul.f32 %v106_v14, %v96_v10  ;;  %v105_v18 = vmul.f32 0.044715, %v99_v15  ;;  %v103_v29 = vmul.f32 0.5, %v99_v15 }
  0xd3   :  { %v110_v19 = vadd.f32 %v108_v17, %v96_v10  ;;  %v107_v20 = vmul.f32 %v105_v18, %v99_v15 }
  0xd5   :  { %v112_v21 = vmul.f32 0.7978846, %v110_v19  ;;  %v109_v22 = vmul.f32 %v107_v20, %v99_v15 }
  0xd7   :  { %324 = vtanh.f32 %v112_v21  ;;  %v111_v23 = vadd.f32 %v109_v22, %v99_v15 }
  0xd9   :  { %v113_v24 = vmul.f32 0.7978846, %v111_v23 }
  0xdb   :  { %326 = vtanh.f32 %v113_v24 }
  0xe4   :  { %v325_v25 = vpop.eup %324 }
  0xe5   :  { %v116_v26 = vadd.f32 1.0, %v325_v25 }
  0xe7   :  { %v118_v31 = vmul.f32 %v116_v26, %v102_v28 }
  0xe8   :  { %v327_v27 = vpop.eup %326 }
  0xe9   :  { %v117_v30 = vadd.f32 1.0, %v327_v27 }
  0xeb   :  { %v119_v32 = vmul.f32 %v117_v30, %v103_v29 }
  0xed   :  { %v120_v33 = vpack.c.bf16 %v119_v32, %v118_v31 }
  0xef   :  { %311 = vmatmul.mubr.msk.bf16.vlgmr.msra.gmra.mxu1 %vm160_vm2, %v120_v33 }
 0x1af   :  { %v198_v36 = vpop.f32.mrf.mxu1 }
 0x1b0   :  { %v199_v37 = vadd.f32 %v274_v34, %v198_v36 }
 0x1b1   :  { %v312_v38 = vpop.f32.mrf.mxu1 }
 0x1b2   :  { %v207_v39 = vadd.f32 %v205_v35, %v199_v37 }
 0x1b3   :  { %v201_v41 = vpop.f32.mrf.mxu1 }
 0x1b4   :  { %v202_v42 = vadd.f32 %v274_v34, %v201_v41  ;;  %v211_v43 = vsel %vm57_vm1, %v207_v39, 0.0 }
 0x1b5   :  { %212 = vadd.xlane.f32.xlu0 %v211_v43  ;;  %v313_v44 = vpop.f32.mrf.mxu1 }
 0x1b6   :  { %v208_v45 = vadd.f32 %v206_v40, %v202_v42 }
 0x1b8   :  { %v214_v46 = vsel %vm57_vm1, %v208_v45, 0.0 }
 0x1b9   :  { %215 = vadd.xlane.f32.xlu0 %v214_v46 }
 0x23e   :  { %v213_v47 = vpop.xlane.xlu0 %212 }
 0x23f   :  { %v218_v48 = vmul.f32 0.03125, %v213_v47 }
 0x241   :  { %v220_v49 = vsub.f32 %v207_v39, %v218_v48 }
 0x242   :  { %v216_v50 = vpop.xlane.xlu0 %215 }
 0x243   :  { %v219_v51 = vmul.f32 0.03125, %v216_v50  ;;  %v222_v52 = vmul.f32 %v220_v49, %v220_v49 }
 0x245   :  { %v221_v53 = vsub.f32 %v208_v45, %v219_v51  ;;  %v224_v54 = vsel %vm57_vm1, %v222_v52, 0.0 }
 0x246   :  { %225 = vadd.xlane.f32.xlu1 %v224_v54 }
 0x247   :  { %v223_v55 = vmul.f32 %v221_v53, %v221_v53 }
 0x249   :  { %v227_v56 = vsel %vm57_vm1, %v223_v55, 0.0 }
 0x24a   :  { %228 = vadd.xlane.f32.xlu1 %v227_v56 }
 0x2cf   :  { %v226_v57 = vpop.xlane.xlu1 %225 }
 0x2d0   :  { %v230_v58 = vmul.f32 0.03125, %v226_v57 }
 0x2d2   :  { %v232_v59 = vadd.f32 1e-12, %v230_v58 }
 0x2d3   :  { %v229_v60 = vpop.xlane.xlu1 %228 }
 0x2d4   :  { %328 = vrsqrt.f32 %v232_v59  ;;  %v231_v61 = vmul.f32 0.03125, %v229_v60 }
 0x2d6   :  { %v233_v62 = vadd.f32 1e-12, %v231_v61 }
 0x2d8   :  { %330 = vrsqrt.f32 %v233_v62 }
 0x2e1   :  { %v329_v63 = vpop.eup %328 }
 0x2e2   :  { %v236_v1 = vmul.f32 %v329_v63, %v220_v49 }
 0x2e4   :  { %v244_v3 = vmul.f32 %v280_v0, %v236_v1 }
 0x2e5   :  { %v331_v4 = vpop.eup %330 }
 0x2e6   :  { %v252_v5 = vadd.f32 %v281_v2, %v244_v3  ;;  %v237_v6 = vmul.f32 %v331_v4, %v221_v53 }
 0x2e8   :  { %v284_v7 = vpack.c.bf16 %v252_v5, %v252_v5  ;;  %v245_v8 = vmul.f32 %v280_v0, %v237_v6 }
 0x2ea   :  { %263 = vst.msk [vmem:[%s425_s7] sm:$0xf] %vm262_vm3, %v284_v7  ;;  %v253_v9 = vadd.f32 %v281_v2, %v245_v8 }
 0x2ec   :  { %v285_v10 = vpack.c.bf16 %v253_v9, %v253_v9 }
 0x2ee   :  { %264 = vst.msk [vmem:[%s425_s7 + $0x4] sm:$0xf] %vm262_vm3, %v285_v10 }

// kernel: bert_base_forward.7
= control target key start
LH: loop header
LB: loop body
LE: loop exit
PB: predicated region body
PF: predicated region fallthrough
CT: control target
= control target key end

     0   :  { %s1638_s17 = smov 0   ;;  %s1640_s18 = smov 0   ;;  %s1813_s0 = inlined_call_operand.vmem [shape: bf16[2,8,32], index: 0, kind: input, shape index: {}, may-alias: {0,1}]   ;;  %s1814_s1 = inlined_call_operand.vmem [shape: bf16[2,8,32], index: 1, kind: input, shape index: {}, may-alias: {0,1}]   ;;  %s1815_s2 = inlined_call_operand.vmem [shape: f32[2,1,8], index: 2, kind: input, shape index: {}]   ;;  %s1816_s3 = inlined_call_operand.vmem [shape: bf16[32,32], index: 3, kind: input, shape index: {}]   ;;  %s1817_s4 = inlined_call_operand.vmem [shape: f32[1,32], index: 4, kind: input, shape index: {}]   ;;  %s1818_s5 = inlined_call_operand.vmem [shape: bf16[32,64], index: 5, kind: input, shape index: {}]   ;;  %s1819_s6 = inlined_call_operand.vmem [shape: f32[1,64], index: 6, kind: input, shape index: {}]   ;;  %s1820_s7 = inlined_call_operand.vmem [shape: bf16[32,32], index: 7, kind: input, shape index: {}]   ;;  %s1821_s8 = inlined_call_operand.vmem [shape: f32[1,32], index: 8, kind: input, shape index: {}]   ;;  %s1822_s9 = inlined_call_operand.vmem [shape: f32[1,32], index: 9, kind: input, shape index: {}]   ;;  %s1823_s10 = inlined_call_operand.vmem [shape: f32[1,32], index: 10, kind: input, shape index: {}]   ;;  %s1824_s11 = inlined_call_operand.vmem [shape: bf16[2,8,32], index: 11, kind: output, shape index: {}]  }
   0x1   :  { %s1642_s19 = smov 0  }
   0x2 LB: > { %s33_s20 = sadd.s32 1, %s1565_s18  ;;  %p1401_p0 = scmp.ge.s32.totalorder %s1569_s19, 1  ;;  %s1569_s19 = sphi %s1642_s19, %s21_s19   ;;  %s1565_s18 = sphi %s1640_s18, %s1826_s18   ;;  %s1561_s17 = sphi %s1638_s17, %s1825_s17  }
   0x3   : > { %p35_p1 = scmp.ge.s32.totalorder %s33_s20, 2  ;;  %p372_p2 = scmp.lt.s32.totalorder %s1569_s19, 3 }
   0x5   : > { %s1828_s20 = smov (%p35_p1, %s33_s20), 0  ;;  %p373_p3 = pnand %p1401_p0, %p372_p2 }
   0x6   : > { %p423_p4 = scmp.lt.s32.totalorder (!%p373_p3), %s1561_s17, 1  ;;  %s1573_s25 = smov (!%p373_p3), 112  }
   0x7   : > { %376 = sbr.rel (%p373_p3) target bundleno = 1999 (0x7cf), region = 64  ;;  %s1576_s30 = smov (!%p373_p3), 96  }
   0x8   : > { %s1577_s15 = smov (!%p373_p3), 16  }
   0xc   : > { %v1531_v0 = vld [vmem:[%s1818_s5 + $0x8] sm:$0xff]   ;;  %v1571_v1 = vmov 0.0   ;;  %v1532_v2 = vld [vmem:[%s1818_s5] sm:$0xff]   ;;  %vm1572_vm0 = vmmov 0   ;;  %s1830_s17 = smov (!%p423_p4, %s1561_s17), 1  ;;  %vm473_vm1 = vcmask 261120   ;;  %v604_v25 = vlaneseq }
   0xd   : > { %1451 = vmatprep.subr.bf16.mxu0 %v1571_v1  ;;  %1459 = vmatprep.subr.bf16.mxu1 %v1571_v1  ;;  %v1533_v3 = vld [vmem:[%s1816_s3 + $0x8] sm:$0xff]   ;;  %v1534_v4 = vld [vmem:[%s1816_s3] sm:$0xff]   ;;  %s1678_s29 = sshll.u32 %s1830_s17, 2  ;;  %vm518_vm2 = vcmask 257024   ;;  %v1574_v23 = vmov 1983009808   ;;  %s436_s28 = scalar_lea.vmem %s1815_s2, %s1830_s17 }
   0xe   : > { %1452 = vmatpush3.bf16.msra.mxu0 %v1531_v0  ;;  %1455 = vmatprep.mubr.msk.bf16.mxu0 %vm1572_vm0, %v1571_v1  ;;  %s433_s13 = scalar_lea.vmem %s1814_s1, %s1678_s29  ;;  %s429_s16 = scalar_lea.vmem %s1813_s0, %s1678_s29  ;;  %v1405_v7 = vld [vmem:[%s1819_s6] ss:$0 sm:$0xff]  ;;  %v602_v24 = vunpack.c.l.s4 %v1574_v23  ;;  %v605_v27 = vshrl.u32 %v604_v25, 7  ;;  %v1575_v28 = vmov 1934713408   ;;  %vm777_vm3 = vcmask 130048  }
   0xf   : > { %1453 = vmatprep.subr.bf16.mxu0 %v1571_v1  ;;  %1463 = vmatprep.mubr.msk.bf16.mxu1 %vm1572_vm0, %v1571_v1  ;;  %v449_v5 = vld [vmem:[%s433_s13] sm:$0xf]  ;;  %v633_v29 = vunpack.c.l.s4 %v1575_v28  ;;  %vm864_vm4 = vcmask 64512  }
  0x10   : > { %1460 = vmatpush3.bf16.msra.mxu1 %v1533_v3  ;;  %v1691_v6 = vld [vmem:[%s429_s16] sm:$0xf]  ;;  %v603_v26 = vunpack.c.0.s8 %v602_v24 }
  0x11   : > { %1461 = vmatprep.subr.bf16.mxu1 %v1571_v1  ;;  %v1410_v16 = vld [vmem:[%s1817_s4] ss:$0 sm:$0xff]  ;;  %v634_v32 = vunpack.c.0.s8 %v633_v29 }
  0x12   : > { %1454 = vmatpush3.bf16.msra.mxu0 %v1532_v2  ;;  %v1713_v31 = vsub.s32 %v603_v26, %v605_v27 }
  0x13   : > { %1467 = vmatprep.subr.bf16.mxu0 %v1571_v1  ;;  %v1717_v36 = vsub.s32 %v634_v32, %v605_v27 }
  0x14   : > { %1462 = vmatpush3.bf16.msra.mxu1 %v1534_v4 }
  0x15   : > { %1456 = vmatmul.mubr.msk.bf16.vlgmr.msra.gmra.mxu0 %vm473_vm1, %v449_v5  ;;  %1473 = vmatprep.subr.bf16.mxu1 %v1571_v1 }
  0x16   : > { %1469 = vmatprep.mubr.msk.bf16.mxu0 %vm1572_vm0, %v1571_v1 }
  0x17   : > { %1464 = vmatmul.mubr.msk.bf16.vlgmr.msra.gmra.mxu1 %vm473_vm1, %v1691_v6 }
  0x18   : > { %1475 = vmatprep.mubr.msk.bf16.mxu1 %vm1572_vm0, %v1571_v1 }
  0xd5   : > { %v511_v8 = vpop.f32.mrf.mxu0 }
  0xd6   : > { %v512_v9 = vadd.f32 %v1405_v7, %v511_v8  ;;  %v1414_v8 = vld [vmem:[%s436_s28] ss:$0 sm:$0xff]  ;;  %s443_s28 = scalar_lea.vmem %s1824_s11, %s1678_s29 }
  0xd7   : > { %v1457_v10 = vpop.f32.mrf.mxu0  ;;  %v589_v12 = vpop.f32.mrf.mxu1 }
  0xd8   : > { %v1703_v11 = vpack.c.bf16 %v512_v9, %v512_v9  ;;  %v590_v18 = vadd.f32 %v1410_v16, %v589_v12 }
  0xd9   : > { %v514_v13 = vpop.f32.mrf.mxu0  ;;  %v1465_v14 = vpop.f32.mrf.mxu1 }
  0xda   : > { %519 = vst.msk [vmem:[#allocation2] sm:$0xf] %vm518_vm2, %v1703_v11  ;;  %v595_v21 = vmul.f32 0.25, %v590_v18 }
  0xdb   : > { %v1458_v15 = vpop.f32.mrf.mxu0  ;;  %v592_v17 = vpop.f32.mrf.mxu1 }
  0xdc   : > { %v600_v33 = vcombine.high %v595_v21, %v1571_v1  ;;  %v607_v35 = vrot.slane %v595_v21, %v1713_v31 }
  0xdd   : > { %v1466_v19 = vpop.f32.mrf.mxu1 }
  0xde   : > { %v614_v39 = vrot.slane %v600_v33, %v1713_v31 }
  0xe1   : > { %v674_v20 = vld [vmem:[#allocation2] sm:$0xf] }
  0xe2   : > { %745 = vxpose.xlu1.c.b16.start.end [1/1] (short) (narrow) %v674_v20, 16  ;;  %676 = vrot.lane.b32.xlu0 %v674_v20, %s1573_s25 }
  0xe6   : > { %597 = vrot.lane.b32.xlu0 %v595_v21, %s1573_s25 }
 0x144   : > { %v753_v22 = vpop.trf.xlu1 }
 0x145   : > { %1468 = vmatpush3.bf16.msra.mxu0 %v753_v22 }
 0x146   : > { %1479 = vmatprep.subr.bf16.mxu0 %v1571_v1 }
 0x154   : > { %v677_v30 = vpop.permute.xlu0 %676 }
 0x155   : > { %761 = vxpose.xlu1.c.b16.start.end [1/1] (short) (narrow) %v677_v30, 16 }
 0x158   : > { %v598_v34 = vpop.permute.xlu0 %597 }
 0x159   : > { %v615_v37 = vcombine.high %v598_v34, %v1571_v1  ;;  %v622_v38 = vrot.slane %v598_v34, %v1713_v31 }
 0x15b   : > { %v629_v40 = vrot.slane %v615_v37, %v1713_v31  ;;  %v630_v41 = vcombine.low %v607_v35, %v622_v38  ;;  %v631_v42 = vcombine.high %v607_v35, %v622_v38 }
 0x15d   : > { %v638_v43 = vrot.slane %v630_v41, %v1717_v36  ;;  %v645_v44 = vrot.slane %v631_v42, %v1717_v36  ;;  %v646_v45 = vcombine.low %v614_v39, %v629_v40  ;;  %v647_v46 = vcombine.high %v614_v39, %v629_v40 }
 0x15f   : > { %v654_v47 = vrot.slane %v646_v45, %v1717_v36  ;;  %v661_v48 = vrot.slane %v647_v46, %v1717_v36  ;;  %v662_v49 = vcombine.high %v638_v43, %v1571_v1  ;;  %v663_v50 = vcombine.high %v645_v44, %v1571_v1 }
 0x161   : > { %v664_v51 = vcombine.high %v654_v47, %v1571_v1  ;;  %v665_v52 = vcombine.high %v661_v48, %v1571_v1  ;;  %v1415_v53 = vpack.c.bf16 %v654_v47, %v638_v43  ;;  %v1416_v54 = vpack.c.bf16 %v661_v48, %v645_v44 }
 0x163   : > { %v698_v55 = vrot.slane %v1415_v53, %v1713_v31  ;;  %v706_v56 = vrot.slane %v1416_v54, %v1713_v31  ;;  %v1417_v57 = vpack.c.bf16 %v664_v51, %v662_v49  ;;  %v1418_v58 = vpack.c.bf16 %v665_v52, %v663_v50 }
 0x165   : > { %v707_v59 = vcombine.low %v698_v55, %v706_v56  ;;  %v722_v60 = vrot.slane %v1417_v57, %v1713_v31  ;;  %v730_v61 = vrot.slane %v1418_v58, %v1713_v31  ;;  %v1535_v56 = vld [vmem:[%s1820_s7 + $0x8] sm:$0xff]  }
 0x167   : > { %v714_v62 = vrot.slane %v707_v59, %v1717_v36  ;;  %v731_v63 = vcombine.low %v722_v60, %v730_v61 }
 0x169   : > { %v738_v0 = vrot.slane %v731_v63, %v1717_v36  ;;  %v742_v3 = vshrl.u32 %v714_v62, 16 }
 0x16b   : > { %v741_v2 = vpack.i.b16 %v738_v0, %v714_v62  ;;  %v743_v4 = vshrl.u32 %v738_v0, 16 }
 0x16d   : > { %1470 = vmatmul.mubr.msk.bf16.vlgmr.msra.gmra.mxu0 %vm777_vm3, %v741_v2  ;;  %v744_v5 = vpack.i.b16 %v743_v4, %v742_v3  ;;  %v1536_v4 = vld [vmem:[%s1820_s7] sm:$0xff]  }
 0x16e   : > { %1481 = vmatprep.mubr.msk.bf16.mxu0 %vm1572_vm0, %v1571_v1 }
 0x1b7   : > { %v769_v7 = vpop.trf.xlu1 }
 0x1b8   : > { %1474 = vmatpush3.bf16.msra.mxu1 %v769_v7 }
 0x1b9   : > { %1485 = vmatprep.subr.bf16.mxu1 %v1571_v1 }
 0x1bb   : > { %1476 = vmatmul.mubr.msk.bf16.vlgmr.msra.gmra.mxu1 %vm777_vm3, %v744_v5 }
 0x1bc   : > { %1487 = vmatprep.mubr.msk.bf16.mxu1 %vm1572_vm0, %v1571_v1 }
 0x22d   : > { %v815_v9 = vpop.f32.mrf.mxu0 }
 0x22e   : > { %v816_v10 = vadd.f32 %v1414_v8, %v815_v9 }
 0x22f   : > { %v1471_v12 = vpop.f32.mrf.mxu0 }
 0x230   : > { %v865_v13 = vsel %vm864_vm4, %v816_v10, -inf }
 0x231   : > { %866 = vmax.xlane.f32.xlu0 %v865_v13  ;;  %v818_v14 = vpop.f32.mrf.mxu0 }
 0x233   : > { %v1472_v15 = vpop.f32.mrf.mxu0 }
 0x27b   : > { %v858_v16 = vpop.f32.mrf.mxu1 }
 0x27c   : > { %v859_v17 = vadd.f32 %v1414_v8, %v858_v16 }
 0x27d   : > { %v1477_v18 = vpop.f32.mrf.mxu1 }
 0x27e   : > { %v868_v19 = vsel %vm864_vm4, %v859_v17, -inf }
 0x27f   : > { %869 = vmax.xlane.f32.xlu1 %v868_v19  ;;  %v861_v20 = vpop.f32.mrf.mxu1 }
 0x281   : > { %v1478_v21 = vpop.f32.mrf.mxu1 }
 0x290   : > { %523 = vrot.lane.b32.xlu1 %v1703_v11, %s1576_s30 }
 0x2ba   : > { %v867_v22 = vpop.xlane.xlu0 %866 }
 0x2bb   : > { %v871_v23 = vsub.f32 %v816_v10, %v867_v22 }
 0x2bd   : > { %v873_v24 = vmul.f32 1.442695, %v871_v23 }
 0x2bf   : > { %1537 = vpow2.f32 %v873_v24 }
 0x2cc   : > { %v1538_v25 = vpop.eup %1537 }
 0x2cd   : > { %v877_v26 = vsel %vm864_vm4, %v1538_v25, 0.0 }
 0x2ce   : > { %878 = vadd.xlane.f32.xlu1 %v877_v26 }
 0x308   : > { %v870_v27 = vpop.xlane.xlu1 %869 }
 0x309   : > { %v872_v28 = vsub.f32 %v859_v17, %v870_v27 }
 0x30b   : > { %v875_v29 = vmul.f32 1.442695, %v872_v28 }
 0x30c   : > { %v524_v30 = vpop.permute.xlu1 %523 }
 0x30d   : > { %1539 = vpow2.f32 %v875_v29  ;;  %526 = vst.msk [vmem:[#allocation3] sm:$0xf] %vm518_vm2, %v524_v30  ;;  %v1267_v29 = vunpack.c.l.bf16 %v1691_v6 }
 0x314   : > { %v679_v11 = vld [vmem:[#allocation3] sm:$0xf] }
 0x31a   : > { %v1540_v32 = vpop.eup %1539 }
 0x31b   : > { %v880_v33 = vsel %vm864_vm4, %v1540_v32, 0.0 }
 0x31c   : > { %881 = vadd.xlane.f32.xlu0 %v880_v33 }
 0x332   : > { %681 = vrot.lane.b32.xlu0 %v679_v11, %s1573_s25 }
 0x350   : > { %889 = vxpose.xlu0.c.b16.start.end [1/1] (short) (narrow) %v679_v11, 16 }
 0x357   : > { %v879_v34 = vpop.xlane.xlu1 %878 }
 0x358   : > { %1541 = vrcp.f32 %v879_v34 }
 0x365   : > { %v1542_v35 = vpop.eup %1541 }
 0x366   : > { %v885_v37 = vmul.f32 %v1542_v35, %v1538_v25 }
 0x368   : > { %v887_v38 = vpack.c.bf16 %v885_v37, %v885_v37 }
 0x36a   : > { %v925_v39 = vsel %vm864_vm4, %v887_v38, 0 }
 0x36b   : > { %1480 = vmatpush3.bf16.xpose.msra.mxu0 %v925_v39 }
 0x36c   : > { %1491 = vmatprep.subr.bf16.mxu0 %v1571_v1 }
 0x3a5   : > { %v882_v40 = vpop.xlane.xlu0 %881 }
 0x3a6   : > { %1543 = vrcp.f32 %v882_v40 }
 0x3a9   : > { %v682_v41 = vpop.permute.xlu0 %681 }
 0x3aa   : > { %905 = vxpose.xlu1.c.b16.start.end [1/1] (short) (narrow) %v682_v41, 16 }
 0x3b2   : > { %v897_v42 = vpop.trf.xlu0 }
 0x3b3   : > { %v1544_v43 = vpop.eup %1543  ;;  %1482 = vmatmul.mubr.msk.bf16.vlgmr.msra.gmra.mxu0 %vm864_vm4, %v897_v42 }
 0x3b4   : > { %v886_v44 = vmul.f32 %v1544_v43, %v1540_v32  ;;  %1495 = vmatprep.mubr.msk.bf16.mxu0 %vm1572_vm0, %v1571_v1  ;;  %1492 = vmatpush3.bf16.msra.mxu0 %v1535_v56 }
 0x3b5   : > { %1493 = vmatprep.subr.bf16.mxu0 %v1571_v1 }
 0x3b6   : > { %v888_v45 = vpack.c.bf16 %v886_v44, %v886_v44 }
 0x3b8   : > { %v972_v46 = vsel %vm864_vm4, %v888_v45, 0  ;;  %1494 = vmatpush3.bf16.msra.mxu0 %v1536_v4  ;;  %v1429_v45 = vld [vmem:[%s1822_s9] ss:$0 sm:$0xff] }
 0x3b9   : > { %1486 = vmatpush3.bf16.xpose.msra.mxu1 %v972_v46 }
 0x40c   : > { %v913_v47 = vpop.trf.xlu1 }
 0x40d   : > { %1488 = vmatmul.mubr.msk.bf16.vlgmr.msra.gmra.mxu1 %vm864_vm4, %v913_v47  ;;  %v1430_v47 = vld [vmem:[%s1823_s10] ss:$0 sm:$0xff] }
 0x473   : > { %v961_v48 = vpop.f32.mrf.mxu0 }
 0x474   : > { %1015 = vxpose.xlu0.b32.start [1/2] (short) (narrow) %v961_v48, 8 }
 0x475   : > { %v1483_v49 = vpop.f32.mrf.mxu0 }
 0x477   : > { %v964_v50 = vpop.f32.mrf.mxu0 }
 0x478   : > { %1016 = vxpose.xlu0.b32.end [2/2] (short) (narrow) %v964_v50, 8 }
 0x479   : > { %v1484_v51 = vpop.f32.mrf.mxu0 }
 0x4cd   : > { %v1008_v52 = vpop.f32.mrf.mxu1 }
 0x4ce   : > { %1047 = vxpose.xlu0.b32.start [1/2] (short) (narrow) %v1008_v52, 8 }
 0x4cf   : > { %v1489_v53 = vpop.f32.mrf.mxu1 }
 0x4d1   : > { %v1011_v54 = vpop.f32.mrf.mxu1 }
 0x4d2   : > { %1048 = vxpose.xlu0.b32.end [2/2] (short) (narrow) %v1011_v54, 8 }
 0x4d3   : > { %v1490_v55 = vpop.f32.mrf.mxu1 }
 0x4f0   : > { %v1031_v57 = vpop.trf.xlu0 }
 0x4f1   : > { %v1079_v58 = vcombine.high %v1031_v57, %v1571_v1  ;;  %v1086_v60 = vrot.slane %v1031_v57, %v1713_v31 }
 0x4f3   : > { %v1093_v63 = vrot.slane %v1079_v58, %v1713_v31 }
 0x54a   : > { %v1063_v59 = vpop.trf.xlu0 }
 0x54b   : > { %v1094_v61 = vcombine.high %v1063_v59, %v1571_v1  ;;  %v1101_v62 = vrot.slane %v1063_v59, %v1713_v31 }
 0x54d   : > { %v1108_v0 = vrot.slane %v1094_v61, %v1713_v31  ;;  %v1109_v2 = vcombine.low %v1086_v60, %v1101_v62  ;;  %v1110_v3 = vcombine.high %v1086_v60, %v1101_v62 }
 0x54f   : > { %v1117_v5 = vrot.slane %v1109_v2, %v1717_v36  ;;  %v1124_v7 = vrot.slane %v1110_v3, %v1717_v36  ;;  %v1125_v8 = vcombine.low %v1093_v63, %v1108_v0  ;;  %v1126_v9 = vcombine.high %v1093_v63, %v1108_v0 }
 0x551   : > { %v1133_v1 = vrot.slane %v1125_v8, %v1717_v36  ;;  %v1140_v10 = vrot.slane %v1126_v9, %v1717_v36  ;;  %v1145_v12 = vcombine.low %v1117_v5, %v1124_v7  ;;  %v1423_v13 = vcombine.high %v1117_v5, %v1124_v7 }
 0x553   : > { %v1152_v14 = vrot.slane %v1145_v12, %v1713_v31  ;;  %v1160_v15 = vrot.slane %v1423_v13, %v1713_v31  ;;  %v1161_v16 = vcombine.low %v1133_v1, %v1140_v10  ;;  %v1424_v17 = vcombine.high %v1133_v1, %v1140_v10 }
 0x555   : > { %v1168_v18 = vrot.slane %v1161_v16, %v1713_v31  ;;  %v1176_v19 = vrot.slane %v1424_v17, %v1713_v31  ;;  %v1177_v20 = vcombine.low %v1152_v14, %v1160_v15  ;;  %v1425_v31 = vld [vmem:[%s1821_s8] ss:$0 sm:$0xff] }
 0x557   : > { %v1185_v21 = vcombine.low %v1168_v18, %v1176_v19  ;;  %v1184_v22 = vrot.slane %v1177_v20, %v1717_v36 }
 0x559   : > { %v1192_v23 = vrot.slane %v1185_v21, %v1717_v36 }
 0x55b   : > { %v1194_v24 = vcombine.high %v1184_v22, %v1192_v23  ;;  %v1193_v25 = vcombine.low %v1184_v22, %v1192_v23 }
 0x55d   : > { %1196 = vrot.lane.b32.xlu0 %v1194_v24, %s1577_s15 }
 0x5cf   : > { %v1197_v26 = vpop.permute.xlu0 %1196 }
 0x5d0   : > { %v1199_v27 = vsel %vm777_vm3, %v1193_v25, %v1197_v26 }
 0x5d1   : > { %v1200_v28 = vpack.c.bf16 %v1199_v27, %v1199_v27 }
 0x5d3   : > { %1496 = vmatmul.mubr.msk.bf16.vlgmr.msra.gmra.mxu0 %vm473_vm1, %v1200_v28 }
 0x693   : > { %v1261_v30 = vpop.f32.mrf.mxu0 }
 0x694   : > { %v1262_v32 = vadd.f32 %v1425_v31, %v1261_v30 }
 0x695   : > { %v1497_v33 = vpop.f32.mrf.mxu0 }
 0x696   : > { %v1268_v36 = vadd.f32 %v1267_v29, %v1262_v32 }
 0x697   : > { %v1264_v11 = vpop.f32.mrf.mxu0 }
 0x698   : > { %v1271_v34 = vsel %vm473_vm1, %v1268_v36, 0.0 }
 0x699   : > { %1272 = vadd.xlane.f32.xlu1 %v1271_v34  ;;  %v1498_v35 = vpop.f32.mrf.mxu0 }
 0x722   : > { %v1273_v37 = vpop.xlane.xlu1 %1272 }
 0x723   : > { %v1275_v38 = vmul.f32 0.03125, %v1273_v37 }
 0x725   : > { %v1276_v39 = vsub.f32 %v1268_v36, %v1275_v38 }
 0x727   : > { %v1277_v40 = vmul.f32 %v1276_v39, %v1276_v39 }
 0x729   : > { %v1278_v41 = vsel %vm473_vm1, %v1277_v40, 0.0 }
 0x72a   : > { %1279 = vadd.xlane.f32.xlu1 %v1278_v41 }
 0x7b3   : > { %v1280_v42 = vpop.xlane.xlu1 %1279 }
 0x7b4   : > { %v1281_v43 = vmul.f32 0.03125, %v1280_v42 }
 0x7b6   : > { %v1282_v6 = vadd.f32 1e-12, %v1281_v43 }
 0x7b8   : > { %1545 = vrsqrt.f32 %v1282_v6 }
 0x7c5   : > { %v1546_v44 = vpop.eup %1545 }
 0x7c6   : > { %v1284_v46 = vmul.f32 %v1546_v44, %v1276_v39 }
 0x7c8   : > { %v1291_v48 = vmul.f32 %v1429_v45, %v1284_v46 }
 0x7ca   : > { %v1298_v49 = vadd.f32 %v1430_v47, %v1291_v48 }
 0x7cc   : > { %v1299_v50 = vpack.c.bf16 %v1298_v49, %v1298_v49 }
 0x7ce   : > { %1301 = vst.msk [vmem:[%s443_s28] sm:$0xf] %vm518_vm2, %v1299_v50 }
 0x7cf PF: > { %s21_s19 = sadd.s32 1, %s1569_s19   ;;  %s1825_s17 = smov %s1565_s18 }
 0x7d0   : > { %p18_p5 = scmp.ge.s32.totalorder %s21_s19, 4   ;;  %s1826_s18 = smov %s1828_s20 }
 0x7d2   :  { %20 = sbr.rel (!%p18_p5) target bundleno = 2 (0x2), region = 104 }

</bundles_post_ra>
